<compile_context>
chip_gen: v5e
topology: v5e:2x2
jax: 0.10.0
libtpu: 0.0.40
codegen_flags: <defaults>
</compile_context>

<pallas_src>
import functools

import jax
import jax.numpy as jnp
from jax.experimental import pallas as pl
from jax.experimental.pallas import tpu as pltpu

ALPHA = 0.2     # LeakyReLU negative slope
LN_EPS = 1e-5   # nn.LayerNorm default eps
LANE = 128
SUBLANE = 8


def _round_up(n, m):
    return (n + m - 1) // m * m


def _layer(h, w, b, g, be, inv_d):
    """Linear -> LeakyReLU -> LayerNorm on the current (tb, Dpad) f32 tile."""
    # MXU matmul: operands in the weight dtype (bf16 by default), f32 accumulation.
    h = jnp.dot(h.astype(w.dtype), w, preferred_element_type=jnp.float32) + b
    h = jnp.where(h >= 0.0, h, ALPHA * h)                     # LeakyReLU (VPU)
    # One-pass LN stats over the TRUE feature width; padding lanes are exactly 0,
    # so plain row sums divided by the true D are exact (no masking needed).
    s1 = jnp.sum(h, axis=-1, keepdims=True)
    s2 = jnp.sum(h * h, axis=-1, keepdims=True)
    mu = s1 * inv_d
    var = s2 * inv_d - mu * mu
    h = (h - mu) * jax.lax.rsqrt(var + LN_EPS)
    return h * g + be      # gamma/beta are 0 on padding lanes -> pad stays 0


def noise_mlp_kernel(x_ref, w1_ref, w_ref, b_ref, g_ref, be_ref, o_ref, *, inv_d):
    b = b_ref[...]
    g = g_ref[...]
    be = be_ref[...]
    h = x_ref[...].astype(jnp.float32)
    h = _layer(h, w1_ref[...], b[0:1], g[0:1], be[0:1], inv_d)
    h = _layer(h, w_ref[0],    b[1:2], g[1:2], be[1:2], inv_d)
    h = _layer(h, w_ref[1],    b[2:3], g[2:3], be[2:3], inv_d)
    h = _layer(h, w_ref[2],    b[3:4], g[3:4], be[3:4], inv_d)
    o_ref[...] = h.astype(o_ref.dtype)


def _pad2(a, rows, cols):
    return jnp.pad(a, ((0, rows - a.shape[0]), (0, cols - a.shape[1])))


def _pack_params(params, d_in_pad, d_pad, matmul_dtype):
    """Pack 16 parameter arrays into 5 lane-padded inputs."""
    w1 = _pad2(params["w1"], d_in_pad, d_pad).astype(matmul_dtype)
    w234 = jnp.stack(
        [_pad2(params[f"w{i}"], d_pad, d_pad) for i in (2, 3, 4)]
    ).astype(matmul_dtype)
    b = jnp.concatenate([_pad2(params[f"b{i}"], 1, d_pad) for i in range(1, 5)], 0)
    g = jnp.concatenate([_pad2(params[f"g{i}"], 1, d_pad) for i in range(1, 5)], 0)
    be = jnp.concatenate([_pad2(params[f"be{i}"], 1, d_pad) for i in range(1, 5)], 0)
    return w1, w234, b, g, be


def _forward(x_pad, packed, *, block_b, d_in_pad, d_pad, inv_d,
             vmem_limit_bytes, single_buffer_params):
    b_pad = x_pad.shape[0]
    grid = (b_pad // block_b,)

    def param_spec(arr):
        idx = lambda i, _nd=arr.ndim: (0,) * _nd
        if single_buffer_params:
            # Grid-invariant parameters: keep ONE resident VMEM copy instead of
            # the default double buffer.
            return pl.BlockSpec(arr.shape, idx, pipeline_mode=pl.Buffered(1))
        return pl.BlockSpec(arr.shape, idx)

    grid_spec = pltpu.PrefetchScalarGridSpec(
        num_scalar_prefetch=0,
        grid=grid,
        in_specs=[pl.BlockSpec((block_b, d_in_pad), lambda i: (i, 0))]
        + [param_spec(p) for p in packed],
        out_specs=pl.BlockSpec((block_b, d_pad), lambda i: (i, 0)),
    )

    return pl.pallas_call(
        functools.partial(noise_mlp_kernel, inv_d=inv_d),
        out_shape=jax.ShapeDtypeStruct((b_pad, d_pad), jnp.float32),
        grid_spec=grid_spec,
        compiler_params=pltpu.CompilerParams(
            dimension_semantics=("parallel",),   # megacore-shardable batch axis
            vmem_limit_bytes=vmem_limit_bytes,
        ),
    )(x_pad, *packed)


def noise_mlp(x, params, *, tb=256, matmul_dtype=jnp.bfloat16):
    """Fused NoiseMLP forward.

    x: (B, D_in) float32.  params: dict from init_params (weights pre-transposed
    to (in, out)).  tb: requested batch tile (rows/grid step); keep B//tb >= 2
    on v7x so both TensorCores get work.  matmul_dtype: MXU operand dtype
    (accumulation is always f32).
    """
    B, d_in = x.shape
    d = params["w1"].shape[1]

    d_in_pad = _round_up(d_in, LANE)
    d_pad = _round_up(d, LANE)

    # Batch tile: multiple of 8 sublanes, no larger than the (padded) batch.
    block_b = _round_up(max(SUBLANE, min(tb, _round_up(B, SUBLANE))), SUBLANE)
    b_pad = _round_up(B, block_b)

    x_pad = jnp.pad(x, ((0, b_pad - B), (0, d_in_pad - d_in)))
    packed = _pack_params(params, d_in_pad, d_pad, matmul_dtype)

    # Explicit VMEM budget: params (worst case double-buffered) + double-buffered
    # in/out tiles, with margin; floor 32 MiB, cap 56 MiB (v7x has 64 MiB/TC).
    param_bytes = sum(int(p.size) * p.dtype.itemsize for p in packed)
    tile_bytes = 4 * block_b * (d_in_pad + d_pad)
    needed = 2 * (param_bytes + tile_bytes)
    vmem_limit_bytes = int(min(max(2 * needed, 32 * 1024 * 1024),
                               56 * 1024 * 1024))

    kwargs = dict(block_b=block_b, d_in_pad=d_in_pad, d_pad=d_pad,
                  inv_d=1.0 / d, vmem_limit_bytes=vmem_limit_bytes)
    try:
        out = _forward(x_pad, packed, single_buffer_params=True, **kwargs)
    except Exception:
        # Fallback for jax builds without BlockSpec(pipeline_mode=pl.Buffered(1)).
        out = _forward(x_pad, packed, single_buffer_params=False, **kwargs)

    return out[:B, :d]


def init_params(key, input_dim, output_dim, alpha=ALPHA):
    """Init matching the PyTorch module (gelu=False):
    kaiming_uniform_(a=alpha) on the (out,in) weight -> bound = sqrt(6/((1+a^2)*fan_in)),
    sampled directly as the transposed (in,out) weight (same iid distribution).
    Linear biases zero; LayerNorm gamma ones / beta zeros.
    """
    params = {}
    fan_ins = [input_dim, output_dim, output_dim, output_dim]
    for i, fan_in in enumerate(fan_ins, start=1):
        key, sub = jax.random.split(key)
        bound = (6.0 / ((1.0 + alpha ** 2) * fan_in)) ** 0.5
        params[f"w{i}"] = jax.random.uniform(
            sub, (fan_in, output_dim), jnp.float32, minval=-bound, maxval=bound)
        params[f"b{i}"] = jnp.zeros((1, output_dim), jnp.float32)
        params[f"g{i}"] = jnp.ones((1, output_dim), jnp.float32)
        params[f"be{i}"] = jnp.zeros((1, output_dim), jnp.float32)
    return params


def noise_mlp_ref(x, params, matmul_dtype=jnp.float32):
    """Pure-JAX reference. matmul_dtype lets us mirror the bf16-operand path."""
    h = x
    for i in range(1, 5):
        w = params[f"w{i}"].astype(matmul_dtype)
        h = jnp.dot(h.astype(matmul_dtype), w,
                    preferred_element_type=jnp.float32) + params[f"b{i}"]
        h = jnp.where(h >= 0.0, h, ALPHA * h)
        mu = jnp.mean(h, axis=-1, keepdims=True)
        var = jnp.mean(jnp.square(h - mu), axis=-1, keepdims=True)
        h = (h - mu) / jnp.sqrt(var + LN_EPS)
        h = h * params[f"g{i}"] + params[f"be{i}"]
    return h


if __name__ == "__main__":
    key = jax.random.PRNGKey(0)
    B, D_IN, D_OUT = 8, 16, 32

    k_x, k_p = jax.random.split(key)
    x = jax.random.normal(k_x, (B, D_IN), jnp.float32)
    params = init_params(k_p, D_IN, D_OUT)

    # f32-operand path: check against the plain f32 reference.
    out_f32 = jax.block_until_ready(noise_mlp(x, params, matmul_dtype=jnp.float32))
    ref_f32 = noise_mlp_ref(x, params, jnp.float32)
    assert out_f32.shape == (B, D_OUT)
    assert jnp.allclose(out_f32, ref_f32, atol=1e-3, rtol=1e-3), "f32 path mismatch"

    # bf16-operand path (performance default): compare against a reference that
    # applies the same operand rounding (accumulation stays f32 in both).
    out_bf16 = jax.block_until_ready(noise_mlp(x, params))
    ref_bf16 = noise_mlp_ref(x, params, jnp.bfloat16)
    assert out_bf16.shape == (B, D_OUT)
    assert jnp.allclose(out_bf16, ref_bf16, atol=3e-3, rtol=3e-3), "bf16 path mismatch"

    print("KERNEL_OK")
</pallas_src>

<mosaic_0001>
module attributes {stable_mosaic.version = 11 : i64} {
  func.func @noise_mlp_kernel(%arg0: i32, %arg1: memref<8x128xf32, #tpu.memory_space<vmem>>, %arg2: memref<128x128xf32, #tpu.memory_space<vmem>>, %arg3: memref<3x128x128xf32, #tpu.memory_space<vmem>>, %arg4: memref<4x128xf32, #tpu.memory_space<vmem>>, %arg5: memref<4x128xf32, #tpu.memory_space<vmem>>, %arg6: memref<4x128xf32, #tpu.memory_space<vmem>>, %arg7: memref<8x128xf32, #tpu.memory_space<vmem>>) attributes {dimension_semantics = [#tpu.dimension_semantics<parallel>], iteration_bounds = array<i64: 1>, scalar_prefetch = 0 : i64, scratch_operands = 0 : i64, tpu.core_type = #tpu.core_type<tc>, window_params = [{transform_indices = @transform_0, window_bounds = array<i64: 8, 128>}, {pipeline_mode = #tpu.pipeline_mode<synchronous>, transform_indices = @transform_1, window_bounds = array<i64: 128, 128>}, {pipeline_mode = #tpu.pipeline_mode<synchronous>, transform_indices = @transform_2, window_bounds = array<i64: 3, 128, 128>}, {pipeline_mode = #tpu.pipeline_mode<synchronous>, transform_indices = @transform_3, window_bounds = array<i64: 4, 128>}, {pipeline_mode = #tpu.pipeline_mode<synchronous>, transform_indices = @transform_4, window_bounds = array<i64: 4, 128>}, {pipeline_mode = #tpu.pipeline_mode<synchronous>, transform_indices = @transform_5, window_bounds = array<i64: 4, 128>}, {transform_indices = @transform_6, window_bounds = array<i64: 8, 128>}]} {
    %c0 = arith.constant 0 : index
    %c0_0 = arith.constant 0 : index
    %0 = vector.load %arg4[%c0, %c0_0] : memref<4x128xf32, #tpu.memory_space<vmem>>, vector<4x128xf32>
    %c0_1 = arith.constant 0 : index
    %c0_2 = arith.constant 0 : index
    %1 = vector.load %arg5[%c0_1, %c0_2] : memref<4x128xf32, #tpu.memory_space<vmem>>, vector<4x128xf32>
    %c0_3 = arith.constant 0 : index
    %c0_4 = arith.constant 0 : index
    %2 = vector.load %arg6[%c0_3, %c0_4] : memref<4x128xf32, #tpu.memory_space<vmem>>, vector<4x128xf32>
    %c0_5 = arith.constant 0 : index
    %c0_6 = arith.constant 0 : index
    %3 = vector.load %arg1[%c0_5, %c0_6] : memref<8x128xf32, #tpu.memory_space<vmem>>, vector<8x128xf32>
    %c0_7 = arith.constant 0 : index
    %c0_8 = arith.constant 0 : index
    %4 = vector.load %arg2[%c0_7, %c0_8] : memref<128x128xf32, #tpu.memory_space<vmem>>, vector<128x128xf32>
    %5 = vector.extract_strided_slice %0 {offsets = [0, 0], sizes = [1, 128], strides = [1, 1]} : vector<4x128xf32> to vector<1x128xf32>
    %6 = vector.extract_strided_slice %1 {offsets = [0, 0], sizes = [1, 128], strides = [1, 1]} : vector<4x128xf32> to vector<1x128xf32>
    %7 = vector.extract_strided_slice %2 {offsets = [0, 0], sizes = [1, 128], strides = [1, 1]} : vector<4x128xf32> to vector<1x128xf32>
    %cst = arith.constant dense<0.000000e+00> : vector<8x128xf32>
    %8 = tpu.matmul %3, %4, %cst {dimension_numbers = #tpu.dot_dimension_numbers<[1], [0], [0], [1], [0, 0, 1, 1], [], []>} : vector<8x128xf32>, vector<128x128xf32>, vector<8x128xf32> -> vector<8x128xf32>
    %9 = vector.broadcast %5 : vector<1x128xf32> to vector<8x128xf32>
    %10 = arith.addf %8, %9 : vector<8x128xf32>
    %cst_9 = arith.constant 0.000000e+00 : f32
    %11 = vector.broadcast %cst_9 : f32 to vector<8x128xf32>
    %12 = arith.cmpf oge, %10, %11 : vector<8x128xf32>
    %cst_10 = arith.constant 2.000000e-01 : f32
    %13 = vector.broadcast %cst_10 : f32 to vector<8x128xf32>
    %14 = arith.mulf %13, %10 : vector<8x128xf32>
    %15 = arith.select %12, %10, %14 : vector<8x128xi1>, vector<8x128xf32>
    %cst_11 = arith.constant dense<0.000000e+00> : vector<8xf32>
    %16 = vector.multi_reduction <add>, %15, %cst_11 [1] : vector<8x128xf32> to vector<8xf32>
    %17 = vector.shape_cast %16 : vector<8xf32> to vector<8x1xf32>
    %18 = arith.mulf %15, %15 : vector<8x128xf32>
    %cst_12 = arith.constant dense<0.000000e+00> : vector<8xf32>
    %19 = vector.multi_reduction <add>, %18, %cst_12 [1] : vector<8x128xf32> to vector<8xf32>
    %20 = vector.shape_cast %19 : vector<8xf32> to vector<8x1xf32>
    %cst_13 = arith.constant 3.125000e-02 : f32
    %21 = vector.broadcast %cst_13 : f32 to vector<8x1xf32>
    %22 = arith.mulf %17, %21 : vector<8x1xf32>
    %cst_14 = arith.constant 3.125000e-02 : f32
    %23 = vector.broadcast %cst_14 : f32 to vector<8x1xf32>
    %24 = arith.mulf %20, %23 : vector<8x1xf32>
    %25 = arith.mulf %22, %22 : vector<8x1xf32>
    %26 = arith.subf %24, %25 : vector<8x1xf32>
    %27 = vector.broadcast %22 : vector<8x1xf32> to vector<8x128xf32>
    %28 = arith.subf %15, %27 : vector<8x128xf32>
    %cst_15 = arith.constant 9.99999974E-6 : f32
    %29 = vector.broadcast %cst_15 : f32 to vector<8x1xf32>
    %30 = arith.addf %26, %29 : vector<8x1xf32>
    %31 = math.rsqrt %30 : vector<8x1xf32>
    %32 = vector.broadcast %31 : vector<8x1xf32> to vector<8x128xf32>
    %33 = arith.mulf %28, %32 : vector<8x128xf32>
    %34 = vector.broadcast %6 : vector<1x128xf32> to vector<8x128xf32>
    %35 = arith.mulf %33, %34 : vector<8x128xf32>
    %36 = vector.broadcast %7 : vector<1x128xf32> to vector<8x128xf32>
    %37 = arith.addf %35, %36 : vector<8x128xf32>
    %c0_16 = arith.constant 0 : index
    %c0_17 = arith.constant 0 : index
    %c0_18 = arith.constant 0 : index
    %38 = vector.load %arg3[%c0_16, %c0_17, %c0_18] : memref<3x128x128xf32, #tpu.memory_space<vmem>>, vector<1x128x128xf32>
    %39 = vector.shape_cast %38 : vector<1x128x128xf32> to vector<128x128xf32>
    %40 = vector.extract_strided_slice %0 {offsets = [1, 0], sizes = [1, 128], strides = [1, 1]} : vector<4x128xf32> to vector<1x128xf32>
    %41 = vector.extract_strided_slice %1 {offsets = [1, 0], sizes = [1, 128], strides = [1, 1]} : vector<4x128xf32> to vector<1x128xf32>
    %42 = vector.extract_strided_slice %2 {offsets = [1, 0], sizes = [1, 128], strides = [1, 1]} : vector<4x128xf32> to vector<1x128xf32>
    %cst_19 = arith.constant dense<0.000000e+00> : vector<8x128xf32>
    %43 = tpu.matmul %37, %39, %cst_19 {dimension_numbers = #tpu.dot_dimension_numbers<[1], [0], [0], [1], [0, 0, 1, 1], [], []>} : vector<8x128xf32>, vector<128x128xf32>, vector<8x128xf32> -> vector<8x128xf32>
    %44 = vector.broadcast %40 : vector<1x128xf32> to vector<8x128xf32>
    %45 = arith.addf %43, %44 : vector<8x128xf32>
    %cst_20 = arith.constant 0.000000e+00 : f32
    %46 = vector.broadcast %cst_20 : f32 to vector<8x128xf32>
    %47 = arith.cmpf oge, %45, %46 : vector<8x128xf32>
    %cst_21 = arith.constant 2.000000e-01 : f32
    %48 = vector.broadcast %cst_21 : f32 to vector<8x128xf32>
    %49 = arith.mulf %48, %45 : vector<8x128xf32>
    %50 = arith.select %47, %45, %49 : vector<8x128xi1>, vector<8x128xf32>
    %cst_22 = arith.constant dense<0.000000e+00> : vector<8xf32>
    %51 = vector.multi_reduction <add>, %50, %cst_22 [1] : vector<8x128xf32> to vector<8xf32>
    %52 = vector.shape_cast %51 : vector<8xf32> to vector<8x1xf32>
    %53 = arith.mulf %50, %50 : vector<8x128xf32>
    %cst_23 = arith.constant dense<0.000000e+00> : vector<8xf32>
    %54 = vector.multi_reduction <add>, %53, %cst_23 [1] : vector<8x128xf32> to vector<8xf32>
    %55 = vector.shape_cast %54 : vector<8xf32> to vector<8x1xf32>
    %cst_24 = arith.constant 3.125000e-02 : f32
    %56 = vector.broadcast %cst_24 : f32 to vector<8x1xf32>
    %57 = arith.mulf %52, %56 : vector<8x1xf32>
    %cst_25 = arith.constant 3.125000e-02 : f32
    %58 = vector.broadcast %cst_25 : f32 to vector<8x1xf32>
    %59 = arith.mulf %55, %58 : vector<8x1xf32>
    %60 = arith.mulf %57, %57 : vector<8x1xf32>
    %61 = arith.subf %59, %60 : vector<8x1xf32>
    %62 = vector.broadcast %57 : vector<8x1xf32> to vector<8x128xf32>
    %63 = arith.subf %50, %62 : vector<8x128xf32>
    %cst_26 = arith.constant 9.99999974E-6 : f32
    %64 = vector.broadcast %cst_26 : f32 to vector<8x1xf32>
    %65 = arith.addf %61, %64 : vector<8x1xf32>
    %66 = math.rsqrt %65 : vector<8x1xf32>
    %67 = vector.broadcast %66 : vector<8x1xf32> to vector<8x128xf32>
    %68 = arith.mulf %63, %67 : vector<8x128xf32>
    %69 = vector.broadcast %41 : vector<1x128xf32> to vector<8x128xf32>
    %70 = arith.mulf %68, %69 : vector<8x128xf32>
    %71 = vector.broadcast %42 : vector<1x128xf32> to vector<8x128xf32>
    %72 = arith.addf %70, %71 : vector<8x128xf32>
    %c1 = arith.constant 1 : index
    %c0_27 = arith.constant 0 : index
    %c0_28 = arith.constant 0 : index
    %73 = vector.load %arg3[%c1, %c0_27, %c0_28] : memref<3x128x128xf32, #tpu.memory_space<vmem>>, vector<1x128x128xf32>
    %74 = vector.shape_cast %73 : vector<1x128x128xf32> to vector<128x128xf32>
    %75 = vector.extract_strided_slice %0 {offsets = [2, 0], sizes = [1, 128], strides = [1, 1]} : vector<4x128xf32> to vector<1x128xf32>
    %76 = vector.extract_strided_slice %1 {offsets = [2, 0], sizes = [1, 128], strides = [1, 1]} : vector<4x128xf32> to vector<1x128xf32>
    %77 = vector.extract_strided_slice %2 {offsets = [2, 0], sizes = [1, 128], strides = [1, 1]} : vector<4x128xf32> to vector<1x128xf32>
    %cst_29 = arith.constant dense<0.000000e+00> : vector<8x128xf32>
    %78 = tpu.matmul %72, %74, %cst_29 {dimension_numbers = #tpu.dot_dimension_numbers<[1], [0], [0], [1], [0, 0, 1, 1], [], []>} : vector<8x128xf32>, vector<128x128xf32>, vector<8x128xf32> -> vector<8x128xf32>
    %79 = vector.broadcast %75 : vector<1x128xf32> to vector<8x128xf32>
    %80 = arith.addf %78, %79 : vector<8x128xf32>
    %cst_30 = arith.constant 0.000000e+00 : f32
    %81 = vector.broadcast %cst_30 : f32 to vector<8x128xf32>
    %82 = arith.cmpf oge, %80, %81 : vector<8x128xf32>
    %cst_31 = arith.constant 2.000000e-01 : f32
    %83 = vector.broadcast %cst_31 : f32 to vector<8x128xf32>
    %84 = arith.mulf %83, %80 : vector<8x128xf32>
    %85 = arith.select %82, %80, %84 : vector<8x128xi1>, vector<8x128xf32>
    %cst_32 = arith.constant dense<0.000000e+00> : vector<8xf32>
    %86 = vector.multi_reduction <add>, %85, %cst_32 [1] : vector<8x128xf32> to vector<8xf32>
    %87 = vector.shape_cast %86 : vector<8xf32> to vector<8x1xf32>
    %88 = arith.mulf %85, %85 : vector<8x128xf32>
    %cst_33 = arith.constant dense<0.000000e+00> : vector<8xf32>
    %89 = vector.multi_reduction <add>, %88, %cst_33 [1] : vector<8x128xf32> to vector<8xf32>
    %90 = vector.shape_cast %89 : vector<8xf32> to vector<8x1xf32>
    %cst_34 = arith.constant 3.125000e-02 : f32
    %91 = vector.broadcast %cst_34 : f32 to vector<8x1xf32>
    %92 = arith.mulf %87, %91 : vector<8x1xf32>
    %cst_35 = arith.constant 3.125000e-02 : f32
    %93 = vector.broadcast %cst_35 : f32 to vector<8x1xf32>
    %94 = arith.mulf %90, %93 : vector<8x1xf32>
    %95 = arith.mulf %92, %92 : vector<8x1xf32>
    %96 = arith.subf %94, %95 : vector<8x1xf32>
    %97 = vector.broadcast %92 : vector<8x1xf32> to vector<8x128xf32>
    %98 = arith.subf %85, %97 : vector<8x128xf32>
    %cst_36 = arith.constant 9.99999974E-6 : f32
    %99 = vector.broadcast %cst_36 : f32 to vector<8x1xf32>
    %100 = arith.addf %96, %99 : vector<8x1xf32>
    %101 = math.rsqrt %100 : vector<8x1xf32>
    %102 = vector.broadcast %101 : vector<8x1xf32> to vector<8x128xf32>
    %103 = arith.mulf %98, %102 : vector<8x128xf32>
    %104 = vector.broadcast %76 : vector<1x128xf32> to vector<8x128xf32>
    %105 = arith.mulf %103, %104 : vector<8x128xf32>
    %106 = vector.broadcast %77 : vector<1x128xf32> to vector<8x128xf32>
    %107 = arith.addf %105, %106 : vector<8x128xf32>
    %c2 = arith.constant 2 : index
    %c0_37 = arith.constant 0 : index
    %c0_38 = arith.constant 0 : index
    %108 = vector.load %arg3[%c2, %c0_37, %c0_38] : memref<3x128x128xf32, #tpu.memory_space<vmem>>, vector<1x128x128xf32>
    %109 = vector.shape_cast %108 : vector<1x128x128xf32> to vector<128x128xf32>
    %110 = vector.extract_strided_slice %0 {offsets = [3, 0], sizes = [1, 128], strides = [1, 1]} : vector<4x128xf32> to vector<1x128xf32>
    %111 = vector.extract_strided_slice %1 {offsets = [3, 0], sizes = [1, 128], strides = [1, 1]} : vector<4x128xf32> to vector<1x128xf32>
    %112 = vector.extract_strided_slice %2 {offsets = [3, 0], sizes = [1, 128], strides = [1, 1]} : vector<4x128xf32> to vector<1x128xf32>
    %cst_39 = arith.constant dense<0.000000e+00> : vector<8x128xf32>
    %113 = tpu.matmul %107, %109, %cst_39 {dimension_numbers = #tpu.dot_dimension_numbers<[1], [0], [0], [1], [0, 0, 1, 1], [], []>} : vector<8x128xf32>, vector<128x128xf32>, vector<8x128xf32> -> vector<8x128xf32>
    %114 = vector.broadcast %110 : vector<1x128xf32> to vector<8x128xf32>
    %115 = arith.addf %113, %114 : vector<8x128xf32>
    %cst_40 = arith.constant 0.000000e+00 : f32
    %116 = vector.broadcast %cst_40 : f32 to vector<8x128xf32>
    %117 = arith.cmpf oge, %115, %116 : vector<8x128xf32>
    %cst_41 = arith.constant 2.000000e-01 : f32
    %118 = vector.broadcast %cst_41 : f32 to vector<8x128xf32>
    %119 = arith.mulf %118, %115 : vector<8x128xf32>
    %120 = arith.select %117, %115, %119 : vector<8x128xi1>, vector<8x128xf32>
    %cst_42 = arith.constant dense<0.000000e+00> : vector<8xf32>
    %121 = vector.multi_reduction <add>, %120, %cst_42 [1] : vector<8x128xf32> to vector<8xf32>
    %122 = vector.shape_cast %121 : vector<8xf32> to vector<8x1xf32>
    %123 = arith.mulf %120, %120 : vector<8x128xf32>
    %cst_43 = arith.constant dense<0.000000e+00> : vector<8xf32>
    %124 = vector.multi_reduction <add>, %123, %cst_43 [1] : vector<8x128xf32> to vector<8xf32>
    %125 = vector.shape_cast %124 : vector<8xf32> to vector<8x1xf32>
    %cst_44 = arith.constant 3.125000e-02 : f32
    %126 = vector.broadcast %cst_44 : f32 to vector<8x1xf32>
    %127 = arith.mulf %122, %126 : vector<8x1xf32>
    %cst_45 = arith.constant 3.125000e-02 : f32
    %128 = vector.broadcast %cst_45 : f32 to vector<8x1xf32>
    %129 = arith.mulf %125, %128 : vector<8x1xf32>
    %130 = arith.mulf %127, %127 : vector<8x1xf32>
    %131 = arith.subf %129, %130 : vector<8x1xf32>
    %132 = vector.broadcast %127 : vector<8x1xf32> to vector<8x128xf32>
    %133 = arith.subf %120, %132 : vector<8x128xf32>
    %cst_46 = arith.constant 9.99999974E-6 : f32
    %134 = vector.broadcast %cst_46 : f32 to vector<8x1xf32>
    %135 = arith.addf %131, %134 : vector<8x1xf32>
    %136 = math.rsqrt %135 : vector<8x1xf32>
    %137 = vector.broadcast %136 : vector<8x1xf32> to vector<8x128xf32>
    %138 = arith.mulf %133, %137 : vector<8x128xf32>
    %139 = vector.broadcast %111 : vector<1x128xf32> to vector<8x128xf32>
    %140 = arith.mulf %138, %139 : vector<8x128xf32>
    %141 = vector.broadcast %112 : vector<1x128xf32> to vector<8x128xf32>
    %142 = arith.addf %140, %141 : vector<8x128xf32>
    %c0_47 = arith.constant 0 : index
    %c0_48 = arith.constant 0 : index
    %143 = vector.load %arg7[%c0_47, %c0_48] : memref<8x128xf32, #tpu.memory_space<vmem>>, vector<8x128xf32>
    tpu.vector_store %arg7[%c0_47, %c0_48], %142 {strides = array<i32>} : memref<8x128xf32, #tpu.memory_space<vmem>>, vector<8x128xf32>,
    return
  }
  func.func @transform_0(%arg0: i32) -> (i32, i32) {
    %c0_i32 = arith.constant 0 : i32
    %c0_i32_0 = arith.constant 0 : i32
    return %arg0, %c0_i32 : i32, i32
  }
  func.func @transform_1(%arg0: i32) -> (i32, i32) {
    %c0_i32 = arith.constant 0 : i32
    %c0_i32_0 = arith.constant 0 : i32
    %c0_i32_1 = arith.constant 0 : i32
    return %c0_i32, %c0_i32_0 : i32, i32
  }
  func.func @transform_2(%arg0: i32) -> (i32, i32, i32) {
    %c0_i32 = arith.constant 0 : i32
    %c0_i32_0 = arith.constant 0 : i32
    %c0_i32_1 = arith.constant 0 : i32
    %c0_i32_2 = arith.constant 0 : i32
    return %c0_i32, %c0_i32_0, %c0_i32_1 : i32, i32, i32
  }
  func.func @transform_3(%arg0: i32) -> (i32, i32) {
    %c0_i32 = arith.constant 0 : i32
    %c0_i32_0 = arith.constant 0 : i32
    %c0_i32_1 = arith.constant 0 : i32
    return %c0_i32, %c0_i32_0 : i32, i32
  }
  func.func @transform_4(%arg0: i32) -> (i32, i32) {
    %c0_i32 = arith.constant 0 : i32
    %c0_i32_0 = arith.constant 0 : i32
    %c0_i32_1 = arith.constant 0 : i32
    return %c0_i32, %c0_i32_0 : i32, i32
  }
  func.func @transform_5(%arg0: i32) -> (i32, i32) {
    %c0_i32 = arith.constant 0 : i32
    %c0_i32_0 = arith.constant 0 : i32
    %c0_i32_1 = arith.constant 0 : i32
    return %c0_i32, %c0_i32_0 : i32, i32
  }
  func.func @transform_6(%arg0: i32) -> (i32, i32) {
    %c0_i32 = arith.constant 0 : i32
    %c0_i32_0 = arith.constant 0 : i32
    return %arg0, %c0_i32 : i32, i32
  }
}

module attributes {stable_mosaic.version = 11 : i64} {
  func.func @noise_mlp_kernel(%arg0: i32, %arg1: memref<8x128xf32, #tpu.memory_space<vmem>>, %arg2: memref<128x128xf32, #tpu.memory_space<vmem>>, %arg3: memref<3x128x128xf32, #tpu.memory_space<vmem>>, %arg4: memref<4x128xf32, #tpu.memory_space<vmem>>, %arg5: memref<4x128xf32, #tpu.memory_space<vmem>>, %arg6: memref<4x128xf32, #tpu.memory_space<vmem>>, %arg7: memref<8x128xf32, #tpu.memory_space<vmem>>) attributes {dimension_semantics = [#tpu.dimension_semantics<parallel>], iteration_bounds = array<i64: 1>, scalar_prefetch = 0 : i64, scratch_operands = 0 : i64, tpu.core_type = #tpu.core_type<tc>, window_params = [{transform_indices = @transform_0, window_bounds = array<i64: 8, 128>}, {pipeline_mode = #tpu.pipeline_mode<synchronous>, transform_indices = @transform_1, window_bounds = array<i64: 128, 128>}, {pipeline_mode = #tpu.pipeline_mode<synchronous>, transform_indices = @transform_2, window_bounds = array<i64: 3, 128, 128>}, {pipeline_mode = #tpu.pipeline_mode<synchronous>, transform_indices = @transform_3, window_bounds = array<i64: 4, 128>}, {pipeline_mode = #tpu.pipeline_mode<synchronous>, transform_indices = @transform_4, window_bounds = array<i64: 4, 128>}, {pipeline_mode = #tpu.pipeline_mode<synchronous>, transform_indices = @transform_5, window_bounds = array<i64: 4, 128>}, {transform_indices = @transform_6, window_bounds = array<i64: 8, 128>}]} {
    %c0 = arith.constant 0 : index
    %c0_0 = arith.constant 0 : index
    %0 = vector.load %arg4[%c0, %c0_0] : memref<4x128xf32, #tpu.memory_space<vmem>>, vector<4x128xf32>
    %c0_1 = arith.constant 0 : index
    %c0_2 = arith.constant 0 : index
    %1 = vector.load %arg5[%c0_1, %c0_2] : memref<4x128xf32, #tpu.memory_space<vmem>>, vector<4x128xf32>
    %c0_3 = arith.constant 0 : index
    %c0_4 = arith.constant 0 : index
    %2 = vector.load %arg6[%c0_3, %c0_4] : memref<4x128xf32, #tpu.memory_space<vmem>>, vector<4x128xf32>
    %c0_5 = arith.constant 0 : index
    %c0_6 = arith.constant 0 : index
    %3 = vector.load %arg1[%c0_5, %c0_6] : memref<8x128xf32, #tpu.memory_space<vmem>>, vector<8x128xf32>
    %c0_7 = arith.constant 0 : index
    %c0_8 = arith.constant 0 : index
    %4 = vector.load %arg2[%c0_7, %c0_8] : memref<128x128xf32, #tpu.memory_space<vmem>>, vector<128x128xf32>
    %5 = vector.extract_strided_slice %0 {offsets = [0, 0], sizes = [1, 128], strides = [1, 1]} : vector<4x128xf32> to vector<1x128xf32>
    %6 = vector.extract_strided_slice %1 {offsets = [0, 0], sizes = [1, 128], strides = [1, 1]} : vector<4x128xf32> to vector<1x128xf32>
    %7 = vector.extract_strided_slice %2 {offsets = [0, 0], sizes = [1, 128], strides = [1, 1]} : vector<4x128xf32> to vector<1x128xf32>
    %cst = arith.constant dense<0.000000e+00> : vector<8x128xf32>
    %8 = tpu.matmul %3, %4, %cst {dimension_numbers = #tpu.dot_dimension_numbers<[1], [0], [0], [1], [0, 0, 1, 1], [], []>} : vector<8x128xf32>, vector<128x128xf32>, vector<8x128xf32> -> vector<8x128xf32>
    %9 = vector.broadcast %5 : vector<1x128xf32> to vector<8x128xf32>
    %10 = arith.addf %8, %9 : vector<8x128xf32>
    %cst_9 = arith.constant 0.000000e+00 : f32
    %11 = vector.broadcast %cst_9 : f32 to vector<8x128xf32>
    %12 = arith.cmpf oge, %10, %11 : vector<8x128xf32>
    %cst_10 = arith.constant 2.000000e-01 : f32
    %13 = vector.broadcast %cst_10 : f32 to vector<8x128xf32>
    %14 = arith.mulf %13, %10 : vector<8x128xf32>
    %15 = arith.select %12, %10, %14 : vector<8x128xi1>, vector<8x128xf32>
    %cst_11 = arith.constant dense<0.000000e+00> : vector<8xf32>
    %16 = vector.multi_reduction <add>, %15, %cst_11 [1] : vector<8x128xf32> to vector<8xf32>
    %17 = vector.shape_cast %16 : vector<8xf32> to vector<8x1xf32>
    %18 = arith.mulf %15, %15 : vector<8x128xf32>
    %cst_12 = arith.constant dense<0.000000e+00> : vector<8xf32>
    %19 = vector.multi_reduction <add>, %18, %cst_12 [1] : vector<8x128xf32> to vector<8xf32>
    %20 = vector.shape_cast %19 : vector<8xf32> to vector<8x1xf32>
    %cst_13 = arith.constant 3.125000e-02 : f32
    %21 = vector.broadcast %cst_13 : f32 to vector<8x1xf32>
    %22 = arith.mulf %17, %21 : vector<8x1xf32>
    %cst_14 = arith.constant 3.125000e-02 : f32
    %23 = vector.broadcast %cst_14 : f32 to vector<8x1xf32>
    %24 = arith.mulf %20, %23 : vector<8x1xf32>
    %25 = arith.mulf %22, %22 : vector<8x1xf32>
    %26 = arith.subf %24, %25 : vector<8x1xf32>
    %27 = vector.broadcast %22 : vector<8x1xf32> to vector<8x128xf32>
    %28 = arith.subf %15, %27 : vector<8x128xf32>
    %cst_15 = arith.constant 9.99999974E-6 : f32
    %29 = vector.broadcast %cst_15 : f32 to vector<8x1xf32>
    %30 = arith.addf %26, %29 : vector<8x1xf32>
    %31 = math.rsqrt %30 : vector<8x1xf32>
    %32 = vector.broadcast %31 : vector<8x1xf32> to vector<8x128xf32>
    %33 = arith.mulf %28, %32 : vector<8x128xf32>
    %34 = vector.broadcast %6 : vector<1x128xf32> to vector<8x128xf32>
    %35 = arith.mulf %33, %34 : vector<8x128xf32>
    %36 = vector.broadcast %7 : vector<1x128xf32> to vector<8x128xf32>
    %37 = arith.addf %35, %36 : vector<8x128xf32>
    %c0_16 = arith.constant 0 : index
    %c0_17 = arith.constant 0 : index
    %c0_18 = arith.constant 0 : index
    %38 = vector.load %arg3[%c0_16, %c0_17, %c0_18] : memref<3x128x128xf32, #tpu.memory_space<vmem>>, vector<1x128x128xf32>
    %39 = vector.shape_cast %38 : vector<1x128x128xf32> to vector<128x128xf32>
    %40 = vector.extract_strided_slice %0 {offsets = [1, 0], sizes = [1, 128], strides = [1, 1]} : vector<4x128xf32> to vector<1x128xf32>
    %41 = vector.extract_strided_slice %1 {offsets = [1, 0], sizes = [1, 128], strides = [1, 1]} : vector<4x128xf32> to vector<1x128xf32>
    %42 = vector.extract_strided_slice %2 {offsets = [1, 0], sizes = [1, 128], strides = [1, 1]} : vector<4x128xf32> to vector<1x128xf32>
    %cst_19 = arith.constant dense<0.000000e+00> : vector<8x128xf32>
    %43 = tpu.matmul %37, %39, %cst_19 {dimension_numbers = #tpu.dot_dimension_numbers<[1], [0], [0], [1], [0, 0, 1, 1], [], []>} : vector<8x128xf32>, vector<128x128xf32>, vector<8x128xf32> -> vector<8x128xf32>
    %44 = vector.broadcast %40 : vector<1x128xf32> to vector<8x128xf32>
    %45 = arith.addf %43, %44 : vector<8x128xf32>
    %cst_20 = arith.constant 0.000000e+00 : f32
    %46 = vector.broadcast %cst_20 : f32 to vector<8x128xf32>
    %47 = arith.cmpf oge, %45, %46 : vector<8x128xf32>
    %cst_21 = arith.constant 2.000000e-01 : f32
    %48 = vector.broadcast %cst_21 : f32 to vector<8x128xf32>
    %49 = arith.mulf %48, %45 : vector<8x128xf32>
    %50 = arith.select %47, %45, %49 : vector<8x128xi1>, vector<8x128xf32>
    %cst_22 = arith.constant dense<0.000000e+00> : vector<8xf32>
    %51 = vector.multi_reduction <add>, %50, %cst_22 [1] : vector<8x128xf32> to vector<8xf32>
    %52 = vector.shape_cast %51 : vector<8xf32> to vector<8x1xf32>
    %53 = arith.mulf %50, %50 : vector<8x128xf32>
    %cst_23 = arith.constant dense<0.000000e+00> : vector<8xf32>
    %54 = vector.multi_reduction <add>, %53, %cst_23 [1] : vector<8x128xf32> to vector<8xf32>
    %55 = vector.shape_cast %54 : vector<8xf32> to vector<8x1xf32>
    %cst_24 = arith.constant 3.125000e-02 : f32
    %56 = vector.broadcast %cst_24 : f32 to vector<8x1xf32>
    %57 = arith.mulf %52, %56 : vector<8x1xf32>
    %cst_25 = arith.constant 3.125000e-02 : f32
    %58 = vector.broadcast %cst_25 : f32 to vector<8x1xf32>
    %59 = arith.mulf %55, %58 : vector<8x1xf32>
    %60 = arith.mulf %57, %57 : vector<8x1xf32>
    %61 = arith.subf %59, %60 : vector<8x1xf32>
    %62 = vector.broadcast %57 : vector<8x1xf32> to vector<8x128xf32>
    %63 = arith.subf %50, %62 : vector<8x128xf32>
    %cst_26 = arith.constant 9.99999974E-6 : f32
    %64 = vector.broadcast %cst_26 : f32 to vector<8x1xf32>
    %65 = arith.addf %61, %64 : vector<8x1xf32>
    %66 = math.rsqrt %65 : vector<8x1xf32>
    %67 = vector.broadcast %66 : vector<8x1xf32> to vector<8x128xf32>
    %68 = arith.mulf %63, %67 : vector<8x128xf32>
    %69 = vector.broadcast %41 : vector<1x128xf32> to vector<8x128xf32>
    %70 = arith.mulf %68, %69 : vector<8x128xf32>
    %71 = vector.broadcast %42 : vector<1x128xf32> to vector<8x128xf32>
    %72 = arith.addf %70, %71 : vector<8x128xf32>
    %c1 = arith.constant 1 : index
    %c0_27 = arith.constant 0 : index
    %c0_28 = arith.constant 0 : index
    %73 = vector.load %arg3[%c1, %c0_27, %c0_28] : memref<3x128x128xf32, #tpu.memory_space<vmem>>, vector<1x128x128xf32>
    %74 = vector.shape_cast %73 : vector<1x128x128xf32> to vector<128x128xf32>
    %75 = vector.extract_strided_slice %0 {offsets = [2, 0], sizes = [1, 128], strides = [1, 1]} : vector<4x128xf32> to vector<1x128xf32>
    %76 = vector.extract_strided_slice %1 {offsets = [2, 0], sizes = [1, 128], strides = [1, 1]} : vector<4x128xf32> to vector<1x128xf32>
    %77 = vector.extract_strided_slice %2 {offsets = [2, 0], sizes = [1, 128], strides = [1, 1]} : vector<4x128xf32> to vector<1x128xf32>
    %cst_29 = arith.constant dense<0.000000e+00> : vector<8x128xf32>
    %78 = tpu.matmul %72, %74, %cst_29 {dimension_numbers = #tpu.dot_dimension_numbers<[1], [0], [0], [1], [0, 0, 1, 1], [], []>} : vector<8x128xf32>, vector<128x128xf32>, vector<8x128xf32> -> vector<8x128xf32>
    %79 = vector.broadcast %75 : vector<1x128xf32> to vector<8x128xf32>
    %80 = arith.addf %78, %79 : vector<8x128xf32>
    %cst_30 = arith.constant 0.000000e+00 : f32
    %81 = vector.broadcast %cst_30 : f32 to vector<8x128xf32>
    %82 = arith.cmpf oge, %80, %81 : vector<8x128xf32>
    %cst_31 = arith.constant 2.000000e-01 : f32
    %83 = vector.broadcast %cst_31 : f32 to vector<8x128xf32>
    %84 = arith.mulf %83, %80 : vector<8x128xf32>
    %85 = arith.select %82, %80, %84 : vector<8x128xi1>, vector<8x128xf32>
    %cst_32 = arith.constant dense<0.000000e+00> : vector<8xf32>
    %86 = vector.multi_reduction <add>, %85, %cst_32 [1] : vector<8x128xf32> to vector<8xf32>
    %87 = vector.shape_cast %86 : vector<8xf32> to vector<8x1xf32>
    %88 = arith.mulf %85, %85 : vector<8x128xf32>
    %cst_33 = arith.constant dense<0.000000e+00> : vector<8xf32>
    %89 = vector.multi_reduction <add>, %88, %cst_33 [1] : vector<8x128xf32> to vector<8xf32>
    %90 = vector.shape_cast %89 : vector<8xf32> to vector<8x1xf32>
    %cst_34 = arith.constant 3.125000e-02 : f32
    %91 = vector.broadcast %cst_34 : f32 to vector<8x1xf32>
    %92 = arith.mulf %87, %91 : vector<8x1xf32>
    %cst_35 = arith.constant 3.125000e-02 : f32
    %93 = vector.broadcast %cst_35 : f32 to vector<8x1xf32>
    %94 = arith.mulf %90, %93 : vector<8x1xf32>
    %95 = arith.mulf %92, %92 : vector<8x1xf32>
    %96 = arith.subf %94, %95 : vector<8x1xf32>
    %97 = vector.broadcast %92 : vector<8x1xf32> to vector<8x128xf32>
    %98 = arith.subf %85, %97 : vector<8x128xf32>
    %cst_36 = arith.constant 9.99999974E-6 : f32
    %99 = vector.broadcast %cst_36 : f32 to vector<8x1xf32>
    %100 = arith.addf %96, %99 : vector<8x1xf32>
    %101 = math.rsqrt %100 : vector<8x1xf32>
    %102 = vector.broadcast %101 : vector<8x1xf32> to vector<8x128xf32>
    %103 = arith.mulf %98, %102 : vector<8x128xf32>
    %104 = vector.broadcast %76 : vector<1x128xf32> to vector<8x128xf32>
    %105 = arith.mulf %103, %104 : vector<8x128xf32>
    %106 = vector.broadcast %77 : vector<1x128xf32> to vector<8x128xf32>
    %107 = arith.addf %105, %106 : vector<8x128xf32>
    %c2 = arith.constant 2 : index
    %c0_37 = arith.constant 0 : index
    %c0_38 = arith.constant 0 : index
    %108 = vector.load %arg3[%c2, %c0_37, %c0_38] : memref<3x128x128xf32, #tpu.memory_space<vmem>>, vector<1x128x128xf32>
    %109 = vector.shape_cast %108 : vector<1x128x128xf32> to vector<128x128xf32>
    %110 = vector.extract_strided_slice %0 {offsets = [3, 0], sizes = [1, 128], strides = [1, 1]} : vector<4x128xf32> to vector<1x128xf32>
    %111 = vector.extract_strided_slice %1 {offsets = [3, 0], sizes = [1, 128], strides = [1, 1]} : vector<4x128xf32> to vector<1x128xf32>
    %112 = vector.extract_strided_slice %2 {offsets = [3, 0], sizes = [1, 128], strides = [1, 1]} : vector<4x128xf32> to vector<1x128xf32>
    %cst_39 = arith.constant dense<0.000000e+00> : vector<8x128xf32>
    %113 = tpu.matmul %107, %109, %cst_39 {dimension_numbers = #tpu.dot_dimension_numbers<[1], [0], [0], [1], [0, 0, 1, 1], [], []>} : vector<8x128xf32>, vector<128x128xf32>, vector<8x128xf32> -> vector<8x128xf32>
    %114 = vector.broadcast %110 : vector<1x128xf32> to vector<8x128xf32>
    %115 = arith.addf %113, %114 : vector<8x128xf32>
    %cst_40 = arith.constant 0.000000e+00 : f32
    %116 = vector.broadcast %cst_40 : f32 to vector<8x128xf32>
    %117 = arith.cmpf oge, %115, %116 : vector<8x128xf32>
    %cst_41 = arith.constant 2.000000e-01 : f32
    %118 = vector.broadcast %cst_41 : f32 to vector<8x128xf32>
    %119 = arith.mulf %118, %115 : vector<8x128xf32>
    %120 = arith.select %117, %115, %119 : vector<8x128xi1>, vector<8x128xf32>
    %cst_42 = arith.constant dense<0.000000e+00> : vector<8xf32>
    %121 = vector.multi_reduction <add>, %120, %cst_42 [1] : vector<8x128xf32> to vector<8xf32>
    %122 = vector.shape_cast %121 : vector<8xf32> to vector<8x1xf32>
    %123 = arith.mulf %120, %120 : vector<8x128xf32>
    %cst_43 = arith.constant dense<0.000000e+00> : vector<8xf32>
    %124 = vector.multi_reduction <add>, %123, %cst_43 [1] : vector<8x128xf32> to vector<8xf32>
    %125 = vector.shape_cast %124 : vector<8xf32> to vector<8x1xf32>
    %cst_44 = arith.constant 3.125000e-02 : f32
    %126 = vector.broadcast %cst_44 : f32 to vector<8x1xf32>
    %127 = arith.mulf %122, %126 : vector<8x1xf32>
    %cst_45 = arith.constant 3.125000e-02 : f32
    %128 = vector.broadcast %cst_45 : f32 to vector<8x1xf32>
    %129 = arith.mulf %125, %128 : vector<8x1xf32>
    %130 = arith.mulf %127, %127 : vector<8x1xf32>
    %131 = arith.subf %129, %130 : vector<8x1xf32>
    %132 = vector.broadcast %127 : vector<8x1xf32> to vector<8x128xf32>
    %133 = arith.subf %120, %132 : vector<8x128xf32>
    %cst_46 = arith.constant 9.99999974E-6 : f32
    %134 = vector.broadcast %cst_46 : f32 to vector<8x1xf32>
    %135 = arith.addf %131, %134 : vector<8x1xf32>
    %136 = math.rsqrt %135 : vector<8x1xf32>
    %137 = vector.broadcast %136 : vector<8x1xf32> to vector<8x128xf32>
    %138 = arith.mulf %133, %137 : vector<8x128xf32>
    %139 = vector.broadcast %111 : vector<1x128xf32> to vector<8x128xf32>
    %140 = arith.mulf %138, %139 : vector<8x128xf32>
    %141 = vector.broadcast %112 : vector<1x128xf32> to vector<8x128xf32>
    %142 = arith.addf %140, %141 : vector<8x128xf32>
    %c0_47 = arith.constant 0 : index
    %c0_48 = arith.constant 0 : index
    %143 = vector.load %arg7[%c0_47, %c0_48] : memref<8x128xf32, #tpu.memory_space<vmem>>, vector<8x128xf32>
    tpu.vector_store %arg7[%c0_47, %c0_48], %142 {strides = array<i32>} : memref<8x128xf32, #tpu.memory_space<vmem>>, vector<8x128xf32>,
    return
  }
  func.func @transform_0(%arg0: i32) -> (i32, i32) {
    %c0_i32 = arith.constant 0 : i32
    %c0_i32_0 = arith.constant 0 : i32
    return %arg0, %c0_i32 : i32, i32
  }
  func.func @transform_1(%arg0: i32) -> (i32, i32) {
    %c0_i32 = arith.constant 0 : i32
    %c0_i32_0 = arith.constant 0 : i32
    %c0_i32_1 = arith.constant 0 : i32
    return %c0_i32, %c0_i32_0 : i32, i32
  }
  func.func @transform_2(%arg0: i32) -> (i32, i32, i32) {
    %c0_i32 = arith.constant 0 : i32
    %c0_i32_0 = arith.constant 0 : i32
    %c0_i32_1 = arith.constant 0 : i32
    %c0_i32_2 = arith.constant 0 : i32
    return %c0_i32, %c0_i32_0, %c0_i32_1 : i32, i32, i32
  }
  func.func @transform_3(%arg0: i32) -> (i32, i32) {
    %c0_i32 = arith.constant 0 : i32
    %c0_i32_0 = arith.constant 0 : i32
    %c0_i32_1 = arith.constant 0 : i32
    return %c0_i32, %c0_i32_0 : i32, i32
  }
  func.func @transform_4(%arg0: i32) -> (i32, i32) {
    %c0_i32 = arith.constant 0 : i32
    %c0_i32_0 = arith.constant 0 : i32
    %c0_i32_1 = arith.constant 0 : i32
    return %c0_i32, %c0_i32_0 : i32, i32
  }
  func.func @transform_5(%arg0: i32) -> (i32, i32) {
    %c0_i32 = arith.constant 0 : i32
    %c0_i32_0 = arith.constant 0 : i32
    %c0_i32_1 = arith.constant 0 : i32
    return %c0_i32, %c0_i32_0 : i32, i32
  }
  func.func @transform_6(%arg0: i32) -> (i32, i32) {
    %c0_i32 = arith.constant 0 : i32
    %c0_i32_0 = arith.constant 0 : i32
    return %arg0, %c0_i32 : i32, i32
  }
}

</mosaic_0001>

<bundles_post_ra>
// kernel: tpu_custom_call.1
= control target key start
LH: loop header
LB: loop body
LE: loop exit
PB: predicated region body
PF: predicated region fallthrough
CT: control target
= control target key end

     0   :  { %11 = vsyncpa [#allocation3], 0  ;;  %s636_s0 = inlined_call_operand.hbm [shape: f32[8,128], index: 0, kind: input, shape index: {}]   ;;  %s637_s1 = inlined_call_operand.hbm [shape: f32[128,128], index: 1, kind: input, shape index: {}]   ;;  %s638_s2 = inlined_call_operand.hbm [shape: f32[3,128,128], index: 2, kind: input, shape index: {}]   ;;  %s639_s3 = inlined_call_operand.hbm [shape: f32[4,128], index: 3, kind: input, shape index: {}]   ;;  %s640_s4 = inlined_call_operand.hbm [shape: f32[4,128], index: 4, kind: input, shape index: {}]   ;;  %s641_s5 = inlined_call_operand.vmem [shape: f32[4,128], index: 5, kind: input, shape index: {}]   ;;  %s642_s6 = inlined_call_operand.hbm [shape: f32[8,128], index: 6, kind: output, shape index: {}]  }
   0x1   :  { %12 = vsyncpa [#allocation6], 0 }
   0x2   :  { %13 = vsyncpa [#allocation9], 0  ;;  %s30_s23 = sshll.u32 %s637_s1, 4  ;;  %s31_s23 = int_to_ptr.hbm [resolvable:$true] %s30_s23 }
   0x3   :  { %14 = vsyncpa [#allocation4], 0  ;;  %s554_s24 = smov [#allocation5]   ;;  %s57_s28 = sshll.u32 %s639_s3, 4  ;;  %s58_s28 = int_to_ptr.hbm [resolvable:$true] %s57_s28 }
   0x4   :  { %s32_s25 = sshll.u32 %s554_s24, 4  ;;  %s555_s29 = smov 128   ;;  %s33_s25 = int_to_ptr.vmem [resolvable:$true] %s32_s25 }
   0x5   :  { %s556_s30 = smov 8   ;;  %s557_s7 = smov [#allocation8]  }
   0x6   :  { %38 = dma.hbm_to_vmem [thread:$0]  %s31_s23, 2048, %s33_s25, [#allocation6], %s555_s29, %s555_s29, %s556_s30  }
   0x7   :  { %s59_s8 = sshll.u32 %s557_s7, 4  ;;  %s20_s11 = sshll.u32 %s636_s0, 4  ;;  %s60_s8 = int_to_ptr.vmem [resolvable:$true] %s59_s8  ;;  %s21_s11 = int_to_ptr.hbm [resolvable:$true] %s20_s11 }
   0x8   :  { %62 = dma.hbm_to_vmem [thread:$0]  %s58_s28, 64, %s60_s8, [#allocation9]  }
   0x9   :  { %s43_s13 = sshll.u32 %s638_s2, 4  ;;  %s558_s14 = smov [#allocation2]   ;;  %s44_s13 = int_to_ptr.hbm [resolvable:$true] %s43_s13 }
   0xa   :  { %s22_s15 = sshll.u32 %s558_s14, 4  ;;  %s559_s3 = smov [#allocation7]   ;;  %s23_s15 = int_to_ptr.vmem [resolvable:$true] %s22_s15 }
   0xb   :  { %25 = dma.hbm_to_vmem [thread:$0]  %s21_s11, 128, %s23_s15, [#allocation3]  }
   0xc   :  { %s45_s16 = sshll.u32 %s559_s3, 4  ;;  %s68_s19 = sshll.u32 %s640_s4, 4  ;;  %s46_s16 = int_to_ptr.vmem [resolvable:$true] %s45_s16  ;;  %s69_s19 = int_to_ptr.hbm [resolvable:$true] %s68_s19 }
   0xd   :  { %51 = dma.hbm_to_vmem [thread:$0]  %s44_s13, 6144, %s46_s16, [#allocation6], %s555_s29, %s555_s29, %s556_s30  }
   0xe   :  { %s560_s0 = smov [#allocation10]  }
   0xf   :  { %s70_s20 = sshll.u32 %s560_s0, 4  ;;  %s71_s20 = int_to_ptr.vmem [resolvable:$true] %s70_s20 }
  0x10   :  { %73 = dma.hbm_to_vmem [thread:$0]  %s69_s19, 64, %s71_s20, [#allocation9]  }
  0x11   :  { %546 = dma.done.wait [#allocation3], 128  }
  0x12   :  { %547 = vsyncadd [#allocation3], 4294967168 }
  0x13   :  { %548 = dma.done.wait [#allocation6], 8192  }
  0x14   :  { %549 = vsyncadd [#allocation6], 4294959104 }
  0x15   :  { %550 = dma.done.wait [#allocation9], 128  }
  0x16   :  { %551 = vsyncadd [#allocation9], 4294967168  ;;  %v115_v0 = vld [vmem:[#allocation5 + $0x78] sm:$0xff]  ;;  %v114_v1 = vld [vmem:[#allocation5 + $0x70] sm:$0xff]  ;;  %s374_s24 = sshll.u32 %s642_s6, 4  ;;  %s375_s24 = int_to_ptr.hbm [resolvable:$true] %s374_s24 }
  0x17   :  { %117 = vmatpush.msra.mxu0 %v115_v0  ;;  %v113_v2 = vld [vmem:[#allocation5 + $0x68] sm:$0xff]  ;;  %v112_v3 = vld [vmem:[#allocation5 + $0x60] sm:$0xff]  ;;  %v111_v4 = vld [vmem:[#allocation5 + $0x58] sm:$0xff] }
  0x18   :  { %v110_v5 = vld [vmem:[#allocation5 + $0x50] sm:$0xff]  ;;  %v109_v6 = vld [vmem:[#allocation5 + $0x48] sm:$0xff]  ;;  %v108_v7 = vld [vmem:[#allocation5 + $0x40] sm:$0xff] }
  0x19   :  { %118 = vmatpush.msra.mxu0 %v114_v1  ;;  %v107_v8 = vld [vmem:[#allocation5 + $0x38] sm:$0xff]  ;;  %v106_v9 = vld [vmem:[#allocation5 + $0x30] sm:$0xff]  ;;  %v105_v10 = vld [vmem:[#allocation5 + $0x28] sm:$0xff] }
  0x1a   :  { %v104_v11 = vld [vmem:[#allocation5 + $0x20] sm:$0xff]  ;;  %v103_v12 = vld [vmem:[#allocation5 + $0x18] sm:$0xff]  ;;  %v102_v13 = vld [vmem:[#allocation5 + $0x10] sm:$0xff] }
  0x1b   :  { %119 = vmatpush.msra.mxu0 %v113_v2  ;;  %v101_v14 = vld [vmem:[#allocation5 + $0x8] sm:$0xff]  ;;  %v100_v15 = vld [vmem:[#allocation5] sm:$0xff]  ;;  %v99_v16 = vld [vmem:[#allocation2] sm:$0xff] }
  0x1c   :  { %v612_v17 = vld [vmem:[#allocation8] sm:$0xf]  ;;  %v181_v24 = vld [vmem:[#allocation7 + $0x78] sm:$0xff]  ;;  %v180_v25 = vld [vmem:[#allocation7 + $0x70] sm:$0xff] }
  0x1d   :  { %120 = vmatpush.msra.mxu0 %v112_v3  ;;  %v116_v18 = vperm.slane %v612_v17, 0  ;;  %183 = vmatpush.msra.mxu1 %v181_v24  ;;  %v179_v26 = vld [vmem:[#allocation7 + $0x68] sm:$0xff]  ;;  %v178_v27 = vld [vmem:[#allocation7 + $0x60] sm:$0xff]  ;;  %v177_v28 = vld [vmem:[#allocation7 + $0x58] sm:$0xff]  ;;  %v182_v62 = vperm.slane %v612_v17, 1 }
  0x1e   :  { %v176_v29 = vld [vmem:[#allocation7 + $0x50] sm:$0xff]  ;;  %v175_v30 = vld [vmem:[#allocation7 + $0x48] sm:$0xff]  ;;  %v174_v31 = vld [vmem:[#allocation7 + $0x40] sm:$0xff] }
  0x1f   :  { %121 = vmatpush.msra.mxu0 %v111_v4  ;;  %184 = vmatpush.msra.mxu1 %v180_v25  ;;  %v173_v32 = vld [vmem:[#allocation7 + $0x38] sm:$0xff]  ;;  %v172_v33 = vld [vmem:[#allocation7 + $0x30] sm:$0xff]  ;;  %v171_v34 = vld [vmem:[#allocation7 + $0x28] sm:$0xff] }
  0x20   :  { %v170_v35 = vld [vmem:[#allocation7 + $0x20] sm:$0xff]  ;;  %v169_v36 = vld [vmem:[#allocation7 + $0x18] sm:$0xff]  ;;  %v168_v37 = vld [vmem:[#allocation7 + $0x10] sm:$0xff] }
  0x21   :  { %122 = vmatpush.msra.mxu0 %v110_v5  ;;  %185 = vmatpush.msra.mxu1 %v179_v26  ;;  %v167_v39 = vld [vmem:[#allocation7 + $0x8] sm:$0xff]  ;;  %v166_v40 = vld [vmem:[#allocation7] sm:$0xff]  ;;  %v620_v53 = vld [vmem:[%s641_s5] sm:$0xf]  ;;  %s561_s5 = smov [#allocation11]  }
  0x22   :  { %v615_v52 = vld [vmem:[#allocation10] sm:$0xf]  ;;  %v164_v59 = vperm.slane %v620_v53, 0  ;;  %v248_v4 = vld [vmem:[#allocation7 + $0xf8] sm:$0xff]  ;;  %v247_v5 = vld [vmem:[#allocation7 + $0xf0] sm:$0xff]  ;;  %s372_s21 = sshll.u32 %s561_s5, 4  ;;  %s373_s21 = int_to_ptr.vmem [resolvable:$true] %s372_s21 }
  0x23   :  { %123 = vmatpush.msra.mxu0 %v109_v6  ;;  %186 = vmatpush.msra.mxu1 %v178_v27  ;;  %v162_v56 = vperm.slane %v615_v52, 0  ;;  %v246_v6 = vld [vmem:[#allocation7 + $0xe8] sm:$0xff] }
  0x24   :  { %250 = vmatpush.msra.mxu2 %v248_v4 }
  0x25   :  { %124 = vmatpush.msra.mxu0 %v108_v7  ;;  %187 = vmatpush.msra.mxu1 %v177_v28  ;;  %v245_v7 = vld [vmem:[#allocation7 + $0xe0] sm:$0xff] }
  0x26   :  { %251 = vmatpush.msra.mxu2 %v247_v5 }
  0x27   :  { %125 = vmatpush.msra.mxu0 %v107_v8  ;;  %188 = vmatpush.msra.mxu1 %v176_v29  ;;  %v244_v8 = vld [vmem:[#allocation7 + $0xd8] sm:$0xff] }
  0x28   :  { %252 = vmatpush.msra.mxu2 %v246_v6 }
  0x29   :  { %126 = vmatpush.msra.mxu0 %v106_v9  ;;  %189 = vmatpush.msra.mxu1 %v175_v30  ;;  %v243_v9 = vld [vmem:[#allocation7 + $0xd0] sm:$0xff] }
  0x2a   :  { %253 = vmatpush.msra.mxu2 %v245_v7 }
  0x2b   :  { %127 = vmatpush.msra.mxu0 %v105_v10  ;;  %190 = vmatpush.msra.mxu1 %v174_v31  ;;  %v242_v10 = vld [vmem:[#allocation7 + $0xc8] sm:$0xff] }
  0x2c   :  { %254 = vmatpush.msra.mxu2 %v244_v8 }
  0x2d   :  { %128 = vmatpush.msra.mxu0 %v104_v11  ;;  %191 = vmatpush.msra.mxu1 %v173_v32  ;;  %v241_v11 = vld [vmem:[#allocation7 + $0xc0] sm:$0xff] }
  0x2e   :  { %255 = vmatpush.msra.mxu2 %v243_v9 }
  0x2f   :  { %129 = vmatpush.msra.mxu0 %v103_v12  ;;  %192 = vmatpush.msra.mxu1 %v172_v33  ;;  %v240_v12 = vld [vmem:[#allocation7 + $0xb8] sm:$0xff] }
  0x30   :  { %256 = vmatpush.msra.mxu2 %v242_v10 }
  0x31   :  { %130 = vmatpush.msra.mxu0 %v102_v13  ;;  %193 = vmatpush.msra.mxu1 %v171_v34  ;;  %v239_v13 = vld [vmem:[#allocation7 + $0xb0] sm:$0xff] }
  0x32   :  { %257 = vmatpush.msra.mxu2 %v241_v11 }
  0x33   :  { %131 = vmatpush.msra.mxu0 %v101_v14  ;;  %194 = vmatpush.msra.mxu1 %v170_v35  ;;  %v238_v14 = vld [vmem:[#allocation7 + $0xa8] sm:$0xff]  ;;  %v228_v35 = vperm.slane %v615_v52, 1 }
  0x34   :  { %258 = vmatpush.msra.mxu2 %v240_v12 }
  0x35   :  { %132 = vmatpush.msra.mxu0 %v100_v15  ;;  %195 = vmatpush.msra.mxu1 %v169_v36  ;;  %v237_v15 = vld [vmem:[#allocation7 + $0xa0] sm:$0xff] }
  0x36   :  { %133 = vmatmul.f32.vlgmr.msra.gmra.mxu0 %v99_v16  ;;  %259 = vmatpush.msra.mxu2 %v239_v13  ;;  %v236_v16 = vld [vmem:[#allocation7 + $0x98] sm:$0xff] }
  0x37   :  { %196 = vmatpush.msra.mxu1 %v168_v37 }
  0x38   :  { %260 = vmatpush.msra.mxu2 %v238_v14 }
  0x39   :  { %197 = vmatpush.msra.mxu1 %v167_v39 }
  0x3a   :  { %261 = vmatpush.msra.mxu2 %v237_v15  ;;  %v295_v15 = vperm.slane %v615_v52, 2 }
  0x3b   :  { %198 = vmatpush.msra.mxu1 %v166_v40 }
  0x3c   :  { %262 = vmatpush.msra.mxu2 %v236_v16 }
  0xb3   :  { %v134_v19 = vpop.f32.mrf.mxu0 }
  0xb4   :  { %v135_v20 = vadd.f32 %v134_v19, %v116_v18  ;;  %v235_v18 = vld [vmem:[#allocation7 + $0x90] sm:$0xff] }
  0xb5   :  { %263 = vmatpush.msra.mxu2 %v235_v18 }
  0xb6   :  { %v138_v21 = vmul.f32 0.2, %v135_v20  ;;  %vm137_vm0 = vcmp.ge.f32.partialorder %v135_v20, 0.0 }
  0xb8   :  { %v139_v22 = vsel %vm137_vm0, %v135_v20, %v138_v21  ;;  %v234_v20 = vld [vmem:[#allocation7 + $0x88] sm:$0xff]  ;;  %v233_v21 = vld [vmem:[#allocation7 + $0x80] sm:$0xff] }
  0xb9   :  { %140 = vadd.xlane.f32.xlu0 %v139_v22  ;;  %v142_v23 = vmul.f32 %v139_v22, %v139_v22  ;;  %264 = vmatpush.msra.mxu2 %v234_v20 }
  0xbb   :  { %265 = vmatpush.msra.mxu2 %v233_v21 }
  0xc1   :  { %143 = vadd.xlane.f32.xlu0 %v142_v23 }
 0x12c   :  { %v141_v38 = vpop.xlane.xlu0 %140 }
 0x12d   :  { %v145_v41 = vmul.f32 0.03125, %v141_v38  ;;  %v230_v38 = vperm.slane %v620_v53, 1 }
 0x12f   :  { %v147_v43 = vmul.f32 %v145_v41, %v145_v41  ;;  %v149_v55 = vsub.f32 %v139_v22, %v145_v41  ;;  %v249_v41 = vperm.slane %v612_v17, 2 }
 0x134   :  { %v144_v42 = vpop.xlane.xlu0 %143 }
 0x135   :  { %v146_v44 = vmul.f32 0.03125, %v144_v42 }
 0x137   :  { %v148_v45 = vsub.f32 %v146_v44, %v147_v43 }
 0x139   :  { %v150_v46 = vadd.f32 1e-05, %v148_v45 }
 0x13b   :  { %394 = vrsqrt.f32 %v150_v46  ;;  %vm157_vm2 = vweird.f32 %v150_v46 }
 0x141   :  { %v395_v47 = vpop.eup %394 }
 0x142   :  { %v152_v48 = vmul.f32 %v395_v47, %v150_v46  ;;  %vm158_vm1 = vweird.f32 %v395_v47 }
 0x143   :  { %vm159_vm3 = vmor %vm157_vm2, %vm158_vm1 }
 0x144   :  { %v153_v49 = vmul.f32 %v395_v47, %v152_v48  ;;  %v314_v48 = vld [vmem:[#allocation7 + $0x170] sm:$0xff] }
 0x146   :  { %v154_v50 = vmul.f32 0.5, %v153_v49  ;;  %v313_v49 = vld [vmem:[#allocation7 + $0x168] sm:$0xff] }
 0x148   :  { %v155_v51 = vsub.f32 1.5, %v154_v50  ;;  %v312_v50 = vld [vmem:[#allocation7 + $0x160] sm:$0xff] }
 0x14a   :  { %v156_v54 = vmul.f32 %v395_v47, %v155_v51  ;;  %v311_v51 = vld [vmem:[#allocation7 + $0x158] sm:$0xff] }
 0x14c   :  { %v160_v57 = vsel %vm159_vm3, %v395_v47, %v156_v54  ;;  %v315_v47 = vld [vmem:[#allocation7 + $0x178] sm:$0xff]  ;;  %v310_v54 = vld [vmem:[#allocation7 + $0x150] sm:$0xff] }
 0x14d   :  { %v161_v58 = vmul.f32 %v160_v57, %v149_v55  ;;  %317 = vmatpush.msra.mxu3 %v315_v47  ;;  %v309_v55 = vld [vmem:[#allocation7 + $0x148] sm:$0xff]  ;;  %v307_v57 = vld [vmem:[#allocation7 + $0x138] sm:$0xff] }
 0x14f   :  { %v163_v60 = vmul.f32 %v162_v56, %v161_v58  ;;  %318 = vmatpush.msra.mxu3 %v314_v48  ;;  %v308_v56 = vld [vmem:[#allocation7 + $0x140] sm:$0xff]  ;;  %v306_v58 = vld [vmem:[#allocation7 + $0x130] sm:$0xff] }
 0x151   :  { %v165_v61 = vadd.f32 %v164_v59, %v163_v60  ;;  %319 = vmatpush.msra.mxu3 %v313_v49  ;;  %v305_v59 = vld [vmem:[#allocation7 + $0x128] sm:$0xff]  ;;  %v304_v60 = vld [vmem:[#allocation7 + $0x120] sm:$0xff] }
 0x153   :  { %199 = vmatmul.f32.vlgmr.msra.gmra.mxu1 %v165_v61  ;;  %320 = vmatpush.msra.mxu3 %v312_v50  ;;  %v303_v61 = vld [vmem:[#allocation7 + $0x118] sm:$0xff] }
 0x155   :  { %321 = vmatpush.msra.mxu3 %v311_v51 }
 0x157   :  { %322 = vmatpush.msra.mxu3 %v310_v54 }
 0x159   :  { %323 = vmatpush.msra.mxu3 %v309_v55 }
 0x15b   :  { %324 = vmatpush.msra.mxu3 %v308_v56 }
 0x15d   :  { %325 = vmatpush.msra.mxu3 %v307_v57 }
 0x15f   :  { %326 = vmatpush.msra.mxu3 %v306_v58 }
 0x161   :  { %327 = vmatpush.msra.mxu3 %v305_v59 }
 0x163   :  { %328 = vmatpush.msra.mxu3 %v304_v60 }
 0x165   :  { %329 = vmatpush.msra.mxu3 %v303_v61 }
 0x1d0   :  { %v200_v63 = vpop.f32.mrf.mxu1 }
 0x1d1   :  { %v201_v0 = vadd.f32 %v200_v63, %v182_v62  ;;  %v302_v62 = vld [vmem:[#allocation7 + $0x110] sm:$0xff] }
 0x1d2   :  { %330 = vmatpush.msra.mxu3 %v302_v62 }
 0x1d3   :  { %v204_v1 = vmul.f32 0.2, %v201_v0  ;;  %vm203_vm4 = vcmp.ge.f32.partialorder %v201_v0, 0.0 }
 0x1d5   :  { %v205_v2 = vsel %vm203_vm4, %v201_v0, %v204_v1  ;;  %v301_v0 = vld [vmem:[#allocation7 + $0x108] sm:$0xff]  ;;  %v300_v1 = vld [vmem:[#allocation7 + $0x100] sm:$0xff] }
 0x1d6   :  { %206 = vadd.xlane.f32.xlu1 %v205_v2  ;;  %v208_v3 = vmul.f32 %v205_v2, %v205_v2  ;;  %331 = vmatpush.msra.mxu3 %v301_v0 }
 0x1d8   :  { %332 = vmatpush.msra.mxu3 %v300_v1 }
 0x1de   :  { %209 = vadd.xlane.f32.xlu1 %v208_v3 }
 0x249   :  { %v207_v19 = vpop.xlane.xlu1 %206 }
 0x24a   :  { %v211_v22 = vmul.f32 0.03125, %v207_v19  ;;  %v297_v19 = vperm.slane %v620_v53, 2 }
 0x24c   :  { %v213_v24 = vmul.f32 %v211_v22, %v211_v22  ;;  %v215_v34 = vsub.f32 %v205_v2, %v211_v22  ;;  %v316_v22 = vperm.slane %v612_v17, 3 }
 0x251   :  { %v210_v23 = vpop.xlane.xlu1 %209 }
 0x252   :  { %v212_v25 = vmul.f32 0.03125, %v210_v23 }
 0x254   :  { %v214_v26 = vsub.f32 %v212_v25, %v213_v24 }
 0x256   :  { %v216_v27 = vadd.f32 1e-05, %v214_v26 }
 0x258   :  { %396 = vrsqrt.f32 %v216_v27  ;;  %vm223_vm6 = vweird.f32 %v216_v27 }
 0x25e   :  { %v397_v28 = vpop.eup %396 }
 0x25f   :  { %v218_v29 = vmul.f32 %v397_v28, %v216_v27  ;;  %vm224_vm5 = vweird.f32 %v397_v28 }
 0x260   :  { %vm225_vm7 = vmor %vm223_vm6, %vm224_vm5 }
 0x261   :  { %v219_v30 = vmul.f32 %v397_v28, %v218_v29 }
 0x263   :  { %v220_v31 = vmul.f32 0.5, %v219_v30 }
 0x265   :  { %v221_v32 = vsub.f32 1.5, %v220_v31 }
 0x267   :  { %v222_v33 = vmul.f32 %v397_v28, %v221_v32 }
 0x269   :  { %v226_v36 = vsel %vm225_vm7, %v397_v28, %v222_v33 }
 0x26a   :  { %v227_v37 = vmul.f32 %v226_v36, %v215_v34 }
 0x26c   :  { %v229_v39 = vmul.f32 %v228_v35, %v227_v37 }
 0x26e   :  { %v231_v40 = vadd.f32 %v230_v38, %v229_v39 }
 0x270   :  { %266 = vmatmul.f32.vlgmr.msra.gmra.mxu2 %v231_v40 }
 0x2f3   :  { %v267_v42 = vpop.f32.mrf.mxu2 }
 0x2f4   :  { %v268_v43 = vadd.f32 %v267_v42, %v249_v41  ;;  %v362_v41 = vperm.slane %v615_v52, 3 }
 0x2f6   :  { %v271_v44 = vmul.f32 0.2, %v268_v43  ;;  %vm270_vm8 = vcmp.ge.f32.partialorder %v268_v43, 0.0 }
 0x2f8   :  { %v272_v45 = vsel %vm270_vm8, %v268_v43, %v271_v44  ;;  %v364_v44 = vperm.slane %v620_v53, 3 }
 0x2f9   :  { %273 = vadd.xlane.f32.xlu2 %v272_v45  ;;  %v275_v46 = vmul.f32 %v272_v45, %v272_v45 }
 0x301   :  { %276 = vadd.xlane.f32.xlu2 %v275_v46 }
 0x36c   :  { %v274_v63 = vpop.xlane.xlu2 %273 }
 0x36d   :  { %v278_v2 = vmul.f32 0.03125, %v274_v63 }
 0x36f   :  { %v280_v4 = vmul.f32 %v278_v2, %v278_v2  ;;  %v282_v14 = vsub.f32 %v272_v45, %v278_v2 }
 0x374   :  { %v277_v3 = vpop.xlane.xlu2 %276 }
 0x375   :  { %v279_v5 = vmul.f32 0.03125, %v277_v3 }
 0x377   :  { %v281_v6 = vsub.f32 %v279_v5, %v280_v4 }
 0x379   :  { %v283_v7 = vadd.f32 1e-05, %v281_v6 }
 0x37b   :  { %398 = vrsqrt.f32 %v283_v7  ;;  %vm290_vm10 = vweird.f32 %v283_v7 }
 0x381   :  { %v399_v8 = vpop.eup %398 }
 0x382   :  { %v285_v9 = vmul.f32 %v399_v8, %v283_v7  ;;  %vm291_vm9 = vweird.f32 %v399_v8 }
 0x383   :  { %vm292_vm11 = vmor %vm290_vm10, %vm291_vm9 }
 0x384   :  { %v286_v10 = vmul.f32 %v399_v8, %v285_v9 }
 0x386   :  { %v287_v11 = vmul.f32 0.5, %v286_v10 }
 0x388   :  { %v288_v12 = vsub.f32 1.5, %v287_v11 }
 0x38a   :  { %v289_v13 = vmul.f32 %v399_v8, %v288_v12 }
 0x38c   :  { %v293_v16 = vsel %vm292_vm11, %v399_v8, %v289_v13 }
 0x38d   :  { %v294_v18 = vmul.f32 %v293_v16, %v282_v14 }
 0x38f   :  { %v296_v20 = vmul.f32 %v295_v15, %v294_v18 }
 0x391   :  { %v298_v21 = vadd.f32 %v297_v19, %v296_v20 }
 0x393   :  { %333 = vmatmul.f32.vlgmr.msra.gmra.mxu3 %v298_v21 }
 0x416   :  { %v334_v23 = vpop.f32.mrf.mxu3 }
 0x417   :  { %v335_v24 = vadd.f32 %v334_v23, %v316_v22 }
 0x419   :  { %v338_v25 = vmul.f32 0.2, %v335_v24  ;;  %vm337_vm12 = vcmp.ge.f32.partialorder %v335_v24, 0.0 }
 0x41b   :  { %v339_v26 = vsel %vm337_vm12, %v335_v24, %v338_v25 }
 0x41c   :  { %340 = vadd.xlane.f32.xlu0 %v339_v26  ;;  %v342_v27 = vmul.f32 %v339_v26, %v339_v26 }
 0x41e   :  { %343 = vadd.xlane.f32.xlu1 %v342_v27 }
 0x48f   :  { %v341_v28 = vpop.xlane.xlu0 %340 }
 0x490   :  { %v345_v29 = vmul.f32 0.03125, %v341_v28 }
 0x491   :  { %v344_v30 = vpop.xlane.xlu1 %343 }
 0x492   :  { %v347_v31 = vmul.f32 %v345_v29, %v345_v29  ;;  %v346_v32 = vmul.f32 0.03125, %v344_v30  ;;  %v349_v40 = vsub.f32 %v339_v26, %v345_v29 }
 0x494   :  { %v348_v33 = vsub.f32 %v346_v32, %v347_v31 }
 0x496   :  { %v350_v34 = vadd.f32 1e-05, %v348_v33 }
 0x498   :  { %400 = vrsqrt.f32 %v350_v34  ;;  %vm357_vm14 = vweird.f32 %v350_v34 }
 0x49e   :  { %v401_v35 = vpop.eup %400 }
 0x49f   :  { %v352_v36 = vmul.f32 %v401_v35, %v350_v34  ;;  %vm358_vm13 = vweird.f32 %v401_v35 }
 0x4a0   :  { %vm359_vm15 = vmor %vm357_vm14, %vm358_vm13 }
 0x4a1   :  { %v353_v37 = vmul.f32 %v401_v35, %v352_v36 }
 0x4a3   :  { %v354_v17 = vmul.f32 0.5, %v353_v37 }
 0x4a5   :  { %v355_v38 = vsub.f32 1.5, %v354_v17 }
 0x4a7   :  { %v356_v39 = vmul.f32 %v401_v35, %v355_v38 }
 0x4a9   :  { %v360_v42 = vsel %vm359_vm15, %v401_v35, %v356_v39 }
 0x4aa   :  { %v361_v43 = vmul.f32 %v360_v42, %v349_v40 }
 0x4ac   :  { %v363_v45 = vmul.f32 %v362_v41, %v361_v43 }
 0x4ae   :  { %v365_v46 = vadd.f32 %v364_v44, %v363_v45 }
 0x4b0   :  { %366 = vst [vmem:[#allocation11] sm:$0xff] %v365_v46 }
 0x4b1   :  { %377 = dma.vmem_to_hbm [thread:$0]  %s373_s21, 128, %s375_s24, [#allocation4]  }
 0x4b2   :  { %552 = dma.done.wait [#allocation4], 128  }
 0x4b3   :  { %553 = vsyncadd [#allocation4], 4294967168 }
 0x4b4   :  { %382 = vsyncpa [#allocation3], 1 }
 0x4b5   :  { %383 = vsyncpa [#allocation6], 1 }
 0x4b6   :  { %384 = vsyncpa [#allocation9], 1 }
 0x4b7   :  { %385 = vsyncpa [#allocation4], 1 }

// kernel: tpu_custom_call.1
= control target key start
LH: loop header
LB: loop body
LE: loop exit
PB: predicated region body
PF: predicated region fallthrough
CT: control target
= control target key end

     0   :  { %11 = vsyncpa [#allocation3], 0  ;;  %s636_s0 = inlined_call_operand.hbm [shape: f32[8,128], index: 0, kind: input, shape index: {}]   ;;  %s637_s1 = inlined_call_operand.hbm [shape: f32[128,128], index: 1, kind: input, shape index: {}]   ;;  %s638_s2 = inlined_call_operand.hbm [shape: f32[3,128,128], index: 2, kind: input, shape index: {}]   ;;  %s639_s3 = inlined_call_operand.hbm [shape: f32[4,128], index: 3, kind: input, shape index: {}]   ;;  %s640_s4 = inlined_call_operand.hbm [shape: f32[4,128], index: 4, kind: input, shape index: {}]   ;;  %s641_s5 = inlined_call_operand.vmem [shape: f32[4,128], index: 5, kind: input, shape index: {}]   ;;  %s642_s6 = inlined_call_operand.hbm [shape: f32[8,128], index: 6, kind: output, shape index: {}]  }
   0x1   :  { %12 = vsyncpa [#allocation6], 0 }
   0x2   :  { %13 = vsyncpa [#allocation9], 0  ;;  %s30_s23 = sshll.u32 %s637_s1, 4  ;;  %s31_s23 = int_to_ptr.hbm [resolvable:$true] %s30_s23 }
   0x3   :  { %14 = vsyncpa [#allocation4], 0  ;;  %s554_s24 = smov [#allocation5]   ;;  %s57_s28 = sshll.u32 %s639_s3, 4  ;;  %s58_s28 = int_to_ptr.hbm [resolvable:$true] %s57_s28 }
   0x4   :  { %s32_s25 = sshll.u32 %s554_s24, 4  ;;  %s555_s29 = smov 128   ;;  %s33_s25 = int_to_ptr.vmem [resolvable:$true] %s32_s25 }
   0x5   :  { %s556_s30 = smov 8   ;;  %s557_s7 = smov [#allocation8]  }
   0x6   :  { %38 = dma.hbm_to_vmem [thread:$0]  %s31_s23, 2048, %s33_s25, [#allocation6], %s555_s29, %s555_s29, %s556_s30  }
   0x7   :  { %s59_s8 = sshll.u32 %s557_s7, 4  ;;  %s20_s11 = sshll.u32 %s636_s0, 4  ;;  %s60_s8 = int_to_ptr.vmem [resolvable:$true] %s59_s8  ;;  %s21_s11 = int_to_ptr.hbm [resolvable:$true] %s20_s11 }
   0x8   :  { %62 = dma.hbm_to_vmem [thread:$0]  %s58_s28, 64, %s60_s8, [#allocation9]  }
   0x9   :  { %s43_s13 = sshll.u32 %s638_s2, 4  ;;  %s558_s14 = smov [#allocation2]   ;;  %s44_s13 = int_to_ptr.hbm [resolvable:$true] %s43_s13 }
   0xa   :  { %s22_s15 = sshll.u32 %s558_s14, 4  ;;  %s559_s3 = smov [#allocation7]   ;;  %s23_s15 = int_to_ptr.vmem [resolvable:$true] %s22_s15 }
   0xb   :  { %25 = dma.hbm_to_vmem [thread:$0]  %s21_s11, 128, %s23_s15, [#allocation3]  }
   0xc   :  { %s45_s16 = sshll.u32 %s559_s3, 4  ;;  %s68_s19 = sshll.u32 %s640_s4, 4  ;;  %s46_s16 = int_to_ptr.vmem [resolvable:$true] %s45_s16  ;;  %s69_s19 = int_to_ptr.hbm [resolvable:$true] %s68_s19 }
   0xd   :  { %51 = dma.hbm_to_vmem [thread:$0]  %s44_s13, 6144, %s46_s16, [#allocation6], %s555_s29, %s555_s29, %s556_s30  }
   0xe   :  { %s560_s0 = smov [#allocation10]  }
   0xf   :  { %s70_s20 = sshll.u32 %s560_s0, 4  ;;  %s71_s20 = int_to_ptr.vmem [resolvable:$true] %s70_s20 }
  0x10   :  { %73 = dma.hbm_to_vmem [thread:$0]  %s69_s19, 64, %s71_s20, [#allocation9]  }
  0x11   :  { %546 = dma.done.wait [#allocation3], 128  }
  0x12   :  { %547 = vsyncadd [#allocation3], 4294967168 }
  0x13   :  { %548 = dma.done.wait [#allocation6], 8192  }
  0x14   :  { %549 = vsyncadd [#allocation6], 4294959104 }
  0x15   :  { %550 = dma.done.wait [#allocation9], 128  }
  0x16   :  { %551 = vsyncadd [#allocation9], 4294967168  ;;  %v115_v0 = vld [vmem:[#allocation5 + $0x78] sm:$0xff]  ;;  %v114_v1 = vld [vmem:[#allocation5 + $0x70] sm:$0xff]  ;;  %s374_s24 = sshll.u32 %s642_s6, 4  ;;  %s375_s24 = int_to_ptr.hbm [resolvable:$true] %s374_s24 }
  0x17   :  { %117 = vmatpush.msra.mxu0 %v115_v0  ;;  %v113_v2 = vld [vmem:[#allocation5 + $0x68] sm:$0xff]  ;;  %v112_v3 = vld [vmem:[#allocation5 + $0x60] sm:$0xff]  ;;  %v111_v4 = vld [vmem:[#allocation5 + $0x58] sm:$0xff] }
  0x18   :  { %v110_v5 = vld [vmem:[#allocation5 + $0x50] sm:$0xff]  ;;  %v109_v6 = vld [vmem:[#allocation5 + $0x48] sm:$0xff]  ;;  %v108_v7 = vld [vmem:[#allocation5 + $0x40] sm:$0xff] }
  0x19   :  { %118 = vmatpush.msra.mxu0 %v114_v1  ;;  %v107_v8 = vld [vmem:[#allocation5 + $0x38] sm:$0xff]  ;;  %v106_v9 = vld [vmem:[#allocation5 + $0x30] sm:$0xff]  ;;  %v105_v10 = vld [vmem:[#allocation5 + $0x28] sm:$0xff] }
  0x1a   :  { %v104_v11 = vld [vmem:[#allocation5 + $0x20] sm:$0xff]  ;;  %v103_v12 = vld [vmem:[#allocation5 + $0x18] sm:$0xff]  ;;  %v102_v13 = vld [vmem:[#allocation5 + $0x10] sm:$0xff] }
  0x1b   :  { %119 = vmatpush.msra.mxu0 %v113_v2  ;;  %v101_v14 = vld [vmem:[#allocation5 + $0x8] sm:$0xff]  ;;  %v100_v15 = vld [vmem:[#allocation5] sm:$0xff]  ;;  %v99_v16 = vld [vmem:[#allocation2] sm:$0xff] }
  0x1c   :  { %v612_v17 = vld [vmem:[#allocation8] sm:$0xf]  ;;  %v181_v24 = vld [vmem:[#allocation7 + $0x78] sm:$0xff]  ;;  %v180_v25 = vld [vmem:[#allocation7 + $0x70] sm:$0xff] }
  0x1d   :  { %120 = vmatpush.msra.mxu0 %v112_v3  ;;  %v116_v18 = vperm.slane %v612_v17, 0  ;;  %183 = vmatpush.msra.mxu1 %v181_v24  ;;  %v179_v26 = vld [vmem:[#allocation7 + $0x68] sm:$0xff]  ;;  %v178_v27 = vld [vmem:[#allocation7 + $0x60] sm:$0xff]  ;;  %v177_v28 = vld [vmem:[#allocation7 + $0x58] sm:$0xff]  ;;  %v182_v62 = vperm.slane %v612_v17, 1 }
  0x1e   :  { %v176_v29 = vld [vmem:[#allocation7 + $0x50] sm:$0xff]  ;;  %v175_v30 = vld [vmem:[#allocation7 + $0x48] sm:$0xff]  ;;  %v174_v31 = vld [vmem:[#allocation7 + $0x40] sm:$0xff] }
  0x1f   :  { %121 = vmatpush.msra.mxu0 %v111_v4  ;;  %184 = vmatpush.msra.mxu1 %v180_v25  ;;  %v173_v32 = vld [vmem:[#allocation7 + $0x38] sm:$0xff]  ;;  %v172_v33 = vld [vmem:[#allocation7 + $0x30] sm:$0xff]  ;;  %v171_v34 = vld [vmem:[#allocation7 + $0x28] sm:$0xff] }
  0x20   :  { %v170_v35 = vld [vmem:[#allocation7 + $0x20] sm:$0xff]  ;;  %v169_v36 = vld [vmem:[#allocation7 + $0x18] sm:$0xff]  ;;  %v168_v37 = vld [vmem:[#allocation7 + $0x10] sm:$0xff] }
  0x21   :  { %122 = vmatpush.msra.mxu0 %v110_v5  ;;  %185 = vmatpush.msra.mxu1 %v179_v26  ;;  %v167_v39 = vld [vmem:[#allocation7 + $0x8] sm:$0xff]  ;;  %v166_v40 = vld [vmem:[#allocation7] sm:$0xff]  ;;  %v620_v53 = vld [vmem:[%s641_s5] sm:$0xf]  ;;  %s561_s5 = smov [#allocation11]  }
  0x22   :  { %v615_v52 = vld [vmem:[#allocation10] sm:$0xf]  ;;  %v164_v59 = vperm.slane %v620_v53, 0  ;;  %v248_v4 = vld [vmem:[#allocation7 + $0xf8] sm:$0xff]  ;;  %v247_v5 = vld [vmem:[#allocation7 + $0xf0] sm:$0xff]  ;;  %s372_s21 = sshll.u32 %s561_s5, 4  ;;  %s373_s21 = int_to_ptr.vmem [resolvable:$true] %s372_s21 }
  0x23   :  { %123 = vmatpush.msra.mxu0 %v109_v6  ;;  %186 = vmatpush.msra.mxu1 %v178_v27  ;;  %v162_v56 = vperm.slane %v615_v52, 0  ;;  %v246_v6 = vld [vmem:[#allocation7 + $0xe8] sm:$0xff] }
  0x24   :  { %250 = vmatpush.msra.mxu2 %v248_v4 }
  0x25   :  { %124 = vmatpush.msra.mxu0 %v108_v7  ;;  %187 = vmatpush.msra.mxu1 %v177_v28  ;;  %v245_v7 = vld [vmem:[#allocation7 + $0xe0] sm:$0xff] }
  0x26   :  { %251 = vmatpush.msra.mxu2 %v247_v5 }
  0x27   :  { %125 = vmatpush.msra.mxu0 %v107_v8  ;;  %188 = vmatpush.msra.mxu1 %v176_v29  ;;  %v244_v8 = vld [vmem:[#allocation7 + $0xd8] sm:$0xff] }
  0x28   :  { %252 = vmatpush.msra.mxu2 %v246_v6 }
  0x29   :  { %126 = vmatpush.msra.mxu0 %v106_v9  ;;  %189 = vmatpush.msra.mxu1 %v175_v30  ;;  %v243_v9 = vld [vmem:[#allocation7 + $0xd0] sm:$0xff] }
  0x2a   :  { %253 = vmatpush.msra.mxu2 %v245_v7 }
  0x2b   :  { %127 = vmatpush.msra.mxu0 %v105_v10  ;;  %190 = vmatpush.msra.mxu1 %v174_v31  ;;  %v242_v10 = vld [vmem:[#allocation7 + $0xc8] sm:$0xff] }
  0x2c   :  { %254 = vmatpush.msra.mxu2 %v244_v8 }
  0x2d   :  { %128 = vmatpush.msra.mxu0 %v104_v11  ;;  %191 = vmatpush.msra.mxu1 %v173_v32  ;;  %v241_v11 = vld [vmem:[#allocation7 + $0xc0] sm:$0xff] }
  0x2e   :  { %255 = vmatpush.msra.mxu2 %v243_v9 }
  0x2f   :  { %129 = vmatpush.msra.mxu0 %v103_v12  ;;  %192 = vmatpush.msra.mxu1 %v172_v33  ;;  %v240_v12 = vld [vmem:[#allocation7 + $0xb8] sm:$0xff] }
  0x30   :  { %256 = vmatpush.msra.mxu2 %v242_v10 }
  0x31   :  { %130 = vmatpush.msra.mxu0 %v102_v13  ;;  %193 = vmatpush.msra.mxu1 %v171_v34  ;;  %v239_v13 = vld [vmem:[#allocation7 + $0xb0] sm:$0xff] }
  0x32   :  { %257 = vmatpush.msra.mxu2 %v241_v11 }
  0x33   :  { %131 = vmatpush.msra.mxu0 %v101_v14  ;;  %194 = vmatpush.msra.mxu1 %v170_v35  ;;  %v238_v14 = vld [vmem:[#allocation7 + $0xa8] sm:$0xff]  ;;  %v228_v35 = vperm.slane %v615_v52, 1 }
  0x34   :  { %258 = vmatpush.msra.mxu2 %v240_v12 }
  0x35   :  { %132 = vmatpush.msra.mxu0 %v100_v15  ;;  %195 = vmatpush.msra.mxu1 %v169_v36  ;;  %v237_v15 = vld [vmem:[#allocation7 + $0xa0] sm:$0xff] }
  0x36   :  { %133 = vmatmul.f32.vlgmr.msra.gmra.mxu0 %v99_v16  ;;  %259 = vmatpush.msra.mxu2 %v239_v13  ;;  %v236_v16 = vld [vmem:[#allocation7 + $0x98] sm:$0xff] }
  0x37   :  { %196 = vmatpush.msra.mxu1 %v168_v37 }
  0x38   :  { %260 = vmatpush.msra.mxu2 %v238_v14 }
  0x39   :  { %197 = vmatpush.msra.mxu1 %v167_v39 }
  0x3a   :  { %261 = vmatpush.msra.mxu2 %v237_v15  ;;  %v295_v15 = vperm.slane %v615_v52, 2 }
  0x3b   :  { %198 = vmatpush.msra.mxu1 %v166_v40 }
  0x3c   :  { %262 = vmatpush.msra.mxu2 %v236_v16 }
  0xb3   :  { %v134_v19 = vpop.f32.mrf.mxu0 }
  0xb4   :  { %v135_v20 = vadd.f32 %v134_v19, %v116_v18  ;;  %v235_v18 = vld [vmem:[#allocation7 + $0x90] sm:$0xff] }
  0xb5   :  { %263 = vmatpush.msra.mxu2 %v235_v18 }
  0xb6   :  { %v138_v21 = vmul.f32 0.2, %v135_v20  ;;  %vm137_vm0 = vcmp.ge.f32.partialorder %v135_v20, 0.0 }
  0xb8   :  { %v139_v22 = vsel %vm137_vm0, %v135_v20, %v138_v21  ;;  %v234_v20 = vld [vmem:[#allocation7 + $0x88] sm:$0xff]  ;;  %v233_v21 = vld [vmem:[#allocation7 + $0x80] sm:$0xff] }
  0xb9   :  { %140 = vadd.xlane.f32.xlu0 %v139_v22  ;;  %v142_v23 = vmul.f32 %v139_v22, %v139_v22  ;;  %264 = vmatpush.msra.mxu2 %v234_v20 }
  0xbb   :  { %265 = vmatpush.msra.mxu2 %v233_v21 }
  0xc1   :  { %143 = vadd.xlane.f32.xlu0 %v142_v23 }
 0x12c   :  { %v141_v38 = vpop.xlane.xlu0 %140 }
 0x12d   :  { %v145_v41 = vmul.f32 0.03125, %v141_v38  ;;  %v230_v38 = vperm.slane %v620_v53, 1 }
 0x12f   :  { %v147_v43 = vmul.f32 %v145_v41, %v145_v41  ;;  %v149_v55 = vsub.f32 %v139_v22, %v145_v41  ;;  %v249_v41 = vperm.slane %v612_v17, 2 }
 0x134   :  { %v144_v42 = vpop.xlane.xlu0 %143 }
 0x135   :  { %v146_v44 = vmul.f32 0.03125, %v144_v42 }
 0x137   :  { %v148_v45 = vsub.f32 %v146_v44, %v147_v43 }
 0x139   :  { %v150_v46 = vadd.f32 1e-05, %v148_v45 }
 0x13b   :  { %394 = vrsqrt.f32 %v150_v46  ;;  %vm157_vm2 = vweird.f32 %v150_v46 }
 0x141   :  { %v395_v47 = vpop.eup %394 }
 0x142   :  { %v152_v48 = vmul.f32 %v395_v47, %v150_v46  ;;  %vm158_vm1 = vweird.f32 %v395_v47 }
 0x143   :  { %vm159_vm3 = vmor %vm157_vm2, %vm158_vm1 }
 0x144   :  { %v153_v49 = vmul.f32 %v395_v47, %v152_v48  ;;  %v314_v48 = vld [vmem:[#allocation7 + $0x170] sm:$0xff] }
 0x146   :  { %v154_v50 = vmul.f32 0.5, %v153_v49  ;;  %v313_v49 = vld [vmem:[#allocation7 + $0x168] sm:$0xff] }
 0x148   :  { %v155_v51 = vsub.f32 1.5, %v154_v50  ;;  %v312_v50 = vld [vmem:[#allocation7 + $0x160] sm:$0xff] }
 0x14a   :  { %v156_v54 = vmul.f32 %v395_v47, %v155_v51  ;;  %v311_v51 = vld [vmem:[#allocation7 + $0x158] sm:$0xff] }
 0x14c   :  { %v160_v57 = vsel %vm159_vm3, %v395_v47, %v156_v54  ;;  %v315_v47 = vld [vmem:[#allocation7 + $0x178] sm:$0xff]  ;;  %v310_v54 = vld [vmem:[#allocation7 + $0x150] sm:$0xff] }
 0x14d   :  { %v161_v58 = vmul.f32 %v160_v57, %v149_v55  ;;  %317 = vmatpush.msra.mxu3 %v315_v47  ;;  %v309_v55 = vld [vmem:[#allocation7 + $0x148] sm:$0xff]  ;;  %v307_v57 = vld [vmem:[#allocation7 + $0x138] sm:$0xff] }
 0x14f   :  { %v163_v60 = vmul.f32 %v162_v56, %v161_v58  ;;  %318 = vmatpush.msra.mxu3 %v314_v48  ;;  %v308_v56 = vld [vmem:[#allocation7 + $0x140] sm:$0xff]  ;;  %v306_v58 = vld [vmem:[#allocation7 + $0x130] sm:$0xff] }
 0x151   :  { %v165_v61 = vadd.f32 %v164_v59, %v163_v60  ;;  %319 = vmatpush.msra.mxu3 %v313_v49  ;;  %v305_v59 = vld [vmem:[#allocation7 + $0x128] sm:$0xff]  ;;  %v304_v60 = vld [vmem:[#allocation7 + $0x120] sm:$0xff] }
 0x153   :  { %199 = vmatmul.f32.vlgmr.msra.gmra.mxu1 %v165_v61  ;;  %320 = vmatpush.msra.mxu3 %v312_v50  ;;  %v303_v61 = vld [vmem:[#allocation7 + $0x118] sm:$0xff] }
 0x155   :  { %321 = vmatpush.msra.mxu3 %v311_v51 }
 0x157   :  { %322 = vmatpush.msra.mxu3 %v310_v54 }
 0x159   :  { %323 = vmatpush.msra.mxu3 %v309_v55 }
 0x15b   :  { %324 = vmatpush.msra.mxu3 %v308_v56 }
 0x15d   :  { %325 = vmatpush.msra.mxu3 %v307_v57 }
 0x15f   :  { %326 = vmatpush.msra.mxu3 %v306_v58 }
 0x161   :  { %327 = vmatpush.msra.mxu3 %v305_v59 }
 0x163   :  { %328 = vmatpush.msra.mxu3 %v304_v60 }
 0x165   :  { %329 = vmatpush.msra.mxu3 %v303_v61 }
 0x1d0   :  { %v200_v63 = vpop.f32.mrf.mxu1 }
 0x1d1   :  { %v201_v0 = vadd.f32 %v200_v63, %v182_v62  ;;  %v302_v62 = vld [vmem:[#allocation7 + $0x110] sm:$0xff] }
 0x1d2   :  { %330 = vmatpush.msra.mxu3 %v302_v62 }
 0x1d3   :  { %v204_v1 = vmul.f32 0.2, %v201_v0  ;;  %vm203_vm4 = vcmp.ge.f32.partialorder %v201_v0, 0.0 }
 0x1d5   :  { %v205_v2 = vsel %vm203_vm4, %v201_v0, %v204_v1  ;;  %v301_v0 = vld [vmem:[#allocation7 + $0x108] sm:$0xff]  ;;  %v300_v1 = vld [vmem:[#allocation7 + $0x100] sm:$0xff] }
 0x1d6   :  { %206 = vadd.xlane.f32.xlu1 %v205_v2  ;;  %v208_v3 = vmul.f32 %v205_v2, %v205_v2  ;;  %331 = vmatpush.msra.mxu3 %v301_v0 }
 0x1d8   :  { %332 = vmatpush.msra.mxu3 %v300_v1 }
 0x1de   :  { %209 = vadd.xlane.f32.xlu1 %v208_v3 }
 0x249   :  { %v207_v19 = vpop.xlane.xlu1 %206 }
 0x24a   :  { %v211_v22 = vmul.f32 0.03125, %v207_v19  ;;  %v297_v19 = vperm.slane %v620_v53, 2 }
 0x24c   :  { %v213_v24 = vmul.f32 %v211_v22, %v211_v22  ;;  %v215_v34 = vsub.f32 %v205_v2, %v211_v22  ;;  %v316_v22 = vperm.slane %v612_v17, 3 }
 0x251   :  { %v210_v23 = vpop.xlane.xlu1 %209 }
 0x252   :  { %v212_v25 = vmul.f32 0.03125, %v210_v23 }
 0x254   :  { %v214_v26 = vsub.f32 %v212_v25, %v213_v24 }
 0x256   :  { %v216_v27 = vadd.f32 1e-05, %v214_v26 }
 0x258   :  { %396 = vrsqrt.f32 %v216_v27  ;;  %vm223_vm6 = vweird.f32 %v216_v27 }
 0x25e   :  { %v397_v28 = vpop.eup %396 }
 0x25f   :  { %v218_v29 = vmul.f32 %v397_v28, %v216_v27  ;;  %vm224_vm5 = vweird.f32 %v397_v28 }
 0x260   :  { %vm225_vm7 = vmor %vm223_vm6, %vm224_vm5 }
 0x261   :  { %v219_v30 = vmul.f32 %v397_v28, %v218_v29 }
 0x263   :  { %v220_v31 = vmul.f32 0.5, %v219_v30 }
 0x265   :  { %v221_v32 = vsub.f32 1.5, %v220_v31 }
 0x267   :  { %v222_v33 = vmul.f32 %v397_v28, %v221_v32 }
 0x269   :  { %v226_v36 = vsel %vm225_vm7, %v397_v28, %v222_v33 }
 0x26a   :  { %v227_v37 = vmul.f32 %v226_v36, %v215_v34 }
 0x26c   :  { %v229_v39 = vmul.f32 %v228_v35, %v227_v37 }
 0x26e   :  { %v231_v40 = vadd.f32 %v230_v38, %v229_v39 }
 0x270   :  { %266 = vmatmul.f32.vlgmr.msra.gmra.mxu2 %v231_v40 }
 0x2f3   :  { %v267_v42 = vpop.f32.mrf.mxu2 }
 0x2f4   :  { %v268_v43 = vadd.f32 %v267_v42, %v249_v41  ;;  %v362_v41 = vperm.slane %v615_v52, 3 }
 0x2f6   :  { %v271_v44 = vmul.f32 0.2, %v268_v43  ;;  %vm270_vm8 = vcmp.ge.f32.partialorder %v268_v43, 0.0 }
 0x2f8   :  { %v272_v45 = vsel %vm270_vm8, %v268_v43, %v271_v44  ;;  %v364_v44 = vperm.slane %v620_v53, 3 }
 0x2f9   :  { %273 = vadd.xlane.f32.xlu2 %v272_v45  ;;  %v275_v46 = vmul.f32 %v272_v45, %v272_v45 }
 0x301   :  { %276 = vadd.xlane.f32.xlu2 %v275_v46 }
 0x36c   :  { %v274_v63 = vpop.xlane.xlu2 %273 }
 0x36d   :  { %v278_v2 = vmul.f32 0.03125, %v274_v63 }
 0x36f   :  { %v280_v4 = vmul.f32 %v278_v2, %v278_v2  ;;  %v282_v14 = vsub.f32 %v272_v45, %v278_v2 }
 0x374   :  { %v277_v3 = vpop.xlane.xlu2 %276 }
 0x375   :  { %v279_v5 = vmul.f32 0.03125, %v277_v3 }
 0x377   :  { %v281_v6 = vsub.f32 %v279_v5, %v280_v4 }
 0x379   :  { %v283_v7 = vadd.f32 1e-05, %v281_v6 }
 0x37b   :  { %398 = vrsqrt.f32 %v283_v7  ;;  %vm290_vm10 = vweird.f32 %v283_v7 }
 0x381   :  { %v399_v8 = vpop.eup %398 }
 0x382   :  { %v285_v9 = vmul.f32 %v399_v8, %v283_v7  ;;  %vm291_vm9 = vweird.f32 %v399_v8 }
 0x383   :  { %vm292_vm11 = vmor %vm290_vm10, %vm291_vm9 }
 0x384   :  { %v286_v10 = vmul.f32 %v399_v8, %v285_v9 }
 0x386   :  { %v287_v11 = vmul.f32 0.5, %v286_v10 }
 0x388   :  { %v288_v12 = vsub.f32 1.5, %v287_v11 }
 0x38a   :  { %v289_v13 = vmul.f32 %v399_v8, %v288_v12 }
 0x38c   :  { %v293_v16 = vsel %vm292_vm11, %v399_v8, %v289_v13 }
 0x38d   :  { %v294_v18 = vmul.f32 %v293_v16, %v282_v14 }
 0x38f   :  { %v296_v20 = vmul.f32 %v295_v15, %v294_v18 }
 0x391   :  { %v298_v21 = vadd.f32 %v297_v19, %v296_v20 }
 0x393   :  { %333 = vmatmul.f32.vlgmr.msra.gmra.mxu3 %v298_v21 }
 0x416   :  { %v334_v23 = vpop.f32.mrf.mxu3 }
 0x417   :  { %v335_v24 = vadd.f32 %v334_v23, %v316_v22 }
 0x419   :  { %v338_v25 = vmul.f32 0.2, %v335_v24  ;;  %vm337_vm12 = vcmp.ge.f32.partialorder %v335_v24, 0.0 }
 0x41b   :  { %v339_v26 = vsel %vm337_vm12, %v335_v24, %v338_v25 }
 0x41c   :  { %340 = vadd.xlane.f32.xlu0 %v339_v26  ;;  %v342_v27 = vmul.f32 %v339_v26, %v339_v26 }
 0x41e   :  { %343 = vadd.xlane.f32.xlu1 %v342_v27 }
 0x48f   :  { %v341_v28 = vpop.xlane.xlu0 %340 }
 0x490   :  { %v345_v29 = vmul.f32 0.03125, %v341_v28 }
 0x491   :  { %v344_v30 = vpop.xlane.xlu1 %343 }
 0x492   :  { %v347_v31 = vmul.f32 %v345_v29, %v345_v29  ;;  %v346_v32 = vmul.f32 0.03125, %v344_v30  ;;  %v349_v40 = vsub.f32 %v339_v26, %v345_v29 }
 0x494   :  { %v348_v33 = vsub.f32 %v346_v32, %v347_v31 }
 0x496   :  { %v350_v34 = vadd.f32 1e-05, %v348_v33 }
 0x498   :  { %400 = vrsqrt.f32 %v350_v34  ;;  %vm357_vm14 = vweird.f32 %v350_v34 }
 0x49e   :  { %v401_v35 = vpop.eup %400 }
 0x49f   :  { %v352_v36 = vmul.f32 %v401_v35, %v350_v34  ;;  %vm358_vm13 = vweird.f32 %v401_v35 }
 0x4a0   :  { %vm359_vm15 = vmor %vm357_vm14, %vm358_vm13 }
 0x4a1   :  { %v353_v37 = vmul.f32 %v401_v35, %v352_v36 }
 0x4a3   :  { %v354_v17 = vmul.f32 0.5, %v353_v37 }
 0x4a5   :  { %v355_v38 = vsub.f32 1.5, %v354_v17 }
 0x4a7   :  { %v356_v39 = vmul.f32 %v401_v35, %v355_v38 }
 0x4a9   :  { %v360_v42 = vsel %vm359_vm15, %v401_v35, %v356_v39 }
 0x4aa   :  { %v361_v43 = vmul.f32 %v360_v42, %v349_v40 }
 0x4ac   :  { %v363_v45 = vmul.f32 %v362_v41, %v361_v43 }
 0x4ae   :  { %v365_v46 = vadd.f32 %v364_v44, %v363_v45 }
 0x4b0   :  { %366 = vst [vmem:[#allocation11] sm:$0xff] %v365_v46 }
 0x4b1   :  { %377 = dma.vmem_to_hbm [thread:$0]  %s373_s21, 128, %s375_s24, [#allocation4]  }
 0x4b2   :  { %552 = dma.done.wait [#allocation4], 128  }
 0x4b3   :  { %553 = vsyncadd [#allocation4], 4294967168 }
 0x4b4   :  { %382 = vsyncpa [#allocation3], 1 }
 0x4b5   :  { %383 = vsyncpa [#allocation6], 1 }
 0x4b6   :  { %384 = vsyncpa [#allocation9], 1 }
 0x4b7   :  { %385 = vsyncpa [#allocation4], 1 }

</bundles_post_ra>
